<compile_context>
chip_gen: v5e
topology: v5e:2x2
jax: 0.10.0
libtpu: 0.0.40
codegen_flags: <defaults>
</compile_context>

<pallas_src>
import functools

import jax
import jax.numpy as jnp
from jax import lax
from jax.experimental import pallas as pl
from jax.experimental.pallas import tpu as pltpu

# Make the in-kernel MXU matmuls and the pure-JAX reference use the same (full f32)
# matmul algorithm so the correctness check can be tight.
jax.config.update("jax_default_matmul_precision", "highest")

_SQRT_2_OVER_PI = 0.7978845608028654


def _gelu(x):
    # tanh-approximate GELU (PyTorch nn.GELU(approximate='tanh')).
    # TODO(synk): PyTorch's default nn.GELU is erf-exact; tanh approx differs by <~1e-3.
    return 0.5 * x * (1.0 + jnp.tanh(_SQRT_2_OVER_PI * (x + 0.044715 * x * x * x)))


def _dense_chi_kernel(bb_ref, chi_ref, true_ref,
                      w1b_ref, w1c_ref, b1_ref,
                      w2_ref, b2_ref,
                      w3_ref, b3_ref,
                      wo_ref, bo_ref,
                      cat_ref, logits_ref, angle_ref, bbout_ref,
                      *, num_chi_bins, chi_feat_dim,
                      bin_min, bin_width, inv_sigma_sq, teacher_force):
    bb = bb_ref[...]                       # (TN, D)
    prev_chi = chi_ref[...]                # (TN, C_prev)

    # --- update_nodes MLP; cat([bb, prev_chi]) @ W1 is fused by splitting W1.
    h = jnp.dot(bb, w1b_ref[...], preferred_element_type=jnp.float32)
    h = h + jnp.dot(prev_chi, w1c_ref[...], preferred_element_type=jnp.float32)
    h = _gelu(h + b1_ref[...])
    h = _gelu(jnp.dot(h, w2_ref[...], preferred_element_type=jnp.float32) + b2_ref[...])
    bb_out = jnp.dot(h, w3_ref[...], preferred_element_type=jnp.float32) + b3_ref[...]

    # --- chi-bin logits.
    logits = jnp.dot(_gelu(bb_out), wo_ref[...],
                     preferred_element_type=jnp.float32) + bo_ref[...]   # (TN, B)

    # --- argmax over bins (first max, like torch.argmax) + degree lookup.
    # index_to_degree_bin[i] == bin_min + i * bin_width, so the "gather" is pure
    # arithmetic -- no table input, no DMA.
    m = jnp.max(logits, axis=-1, keepdims=True)
    col = lax.broadcasted_iota(jnp.int32, logits.shape, 1)
    idx = jnp.min(jnp.where(logits == m, col, num_chi_bins),
                  axis=-1, keepdims=True)                                # (TN, 1)
    pred_angle = bin_min + idx.astype(jnp.float32) * bin_width           # (TN, 1)

    # --- binned-degree basis function (circular Gaussian RBF) + nan_to_num.
    # TODO(synk): rotamer_builder.compute_binned_degree_basis_function is external;
    # a circular Gaussian RBF over uniform degree bins (sigma = bin width) is used.
    ang = true_ref[...] if teacher_force else pred_angle                 # (TN, 1)
    tn = logits.shape[0]
    centers = bin_min + bin_width * lax.broadcasted_iota(
        jnp.int32, (tn, num_chi_bins), 1).astype(jnp.float32)            # (TN, B)
    diff = ang - centers
    diff = diff - 360.0 * jnp.floor((diff + 180.0) / 360.0)              # wrap [-180,180)
    enc = jnp.exp(-(diff * diff) * inv_sigma_sq)
    enc = jnp.where(jnp.isnan(enc), 0.0, enc)                            # .nan_to_num()

    # --- outputs; cat([prev_chi, enc]) written directly into one buffer.
    cat_ref[:, :chi_feat_dim] = prev_chi
    cat_ref[:, chi_feat_dim:chi_feat_dim + num_chi_bins] = enc
    logits_ref[...] = logits
    angle_ref[...] = pred_angle
    bbout_ref[...] = bb_out


def _round_up(a, b):
    return (a + b - 1) // b * b


def dense_chi_layer(bb_nodes, prev_chi, true_chi, params, *,
                    num_chi_bins, chi_idx, teacher_force,
                    bin_min=-180.0, row_tile=256):
    """Pallas forward of DenseChiLayer (dropout is defined but unused in forward)."""
    N, D = bb_nodes.shape
    c_prev = prev_chi.shape[1]
    assert c_prev == num_chi_bins * chi_idx
    bin_width = 360.0 / num_chi_bins
    inv_sigma_sq = 1.0 / (bin_width * bin_width)

    w1, b1 = params["w1"], params["b1"]          # (D + c_prev, D), (D,)
    w2, b2 = params["w2"], params["b2"]
    w3, b3 = params["w3"], params["b3"]
    wo, bo = params["wo"], params["bo"]          # (D, B), (B,)
    w1_bb, w1_chi = w1[:D], w1[D:]

    true_col = true_chi[:, chi_idx:chi_idx + 1].astype(jnp.float32)      # (N, 1)

    # Big row tiles (perf feedback: 256-512), clamped for small N.  At D=128 a
    # 256-row tile is ~128 KiB per buffer -> fits the default scoped-VMEM limit on
    # v5e/v6e and within v7x's 64 MiB physical VMEM with plenty of headroom.
    tn = min(row_tile, _round_up(N, 8))
    n_pad = _round_up(N, tn)
    pad = n_pad - N
    bb_p = jnp.pad(bb_nodes.astype(jnp.float32), ((0, pad), (0, 0)))
    chi_p = jnp.pad(prev_chi.astype(jnp.float32), ((0, pad), (0, 0)))
    true_p = jnp.pad(true_col, ((0, pad), (0, 0)))

    kernel = functools.partial(
        _dense_chi_kernel,
        num_chi_bins=num_chi_bins, chi_feat_dim=c_prev,
        bin_min=float(bin_min), bin_width=float(bin_width),
        inv_sigma_sq=float(inv_sigma_sq), teacher_force=bool(teacher_force))

    row = lambda c: pl.BlockSpec((tn, c), lambda i: (i, 0))
    full = lambda r, c: pl.BlockSpec((r, c), lambda i: (0, 0))

    out_shape = (
        jax.ShapeDtypeStruct((n_pad, c_prev + num_chi_bins), jnp.float32),  # cat
        jax.ShapeDtypeStruct((n_pad, num_chi_bins), jnp.float32),           # logits
        jax.ShapeDtypeStruct((n_pad, 1), jnp.float32),                      # angle
        jax.ShapeDtypeStruct((n_pad, D), jnp.float32),                      # bb_nodes
    )

    cat_o, logits_o, angle_o, bb_o = pl.pallas_call(
        kernel,
        out_shape=out_shape,
        grid_spec=pltpu.PrefetchScalarGridSpec(
            num_scalar_prefetch=0,
            grid=(n_pad // tn,),
            in_specs=[
                row(D), row(c_prev), row(1),
                full(D, D), full(c_prev, D), full(1, D),
                full(D, D), full(1, D),
                full(D, D), full(1, D),
                full(D, num_chi_bins), full(1, num_chi_bins),
            ],
            out_specs=[
                row(c_prev + num_chi_bins), row(num_chi_bins), row(1), row(D),
            ],
        ),
        compiler_params=pltpu.CompilerParams(
            dimension_semantics=("parallel",)),   # megacore-shardable row axis
    )(bb_p, chi_p, true_p,
      w1_bb, w1_chi, b1.reshape(1, D),
      w2, b2.reshape(1, D),
      w3, b3.reshape(1, D),
      wo, bo.reshape(1, num_chi_bins))

    return cat_o[:N], logits_o[:N], angle_o[:N, 0], bb_o[:N]


if __name__ == "__main__":
    # Small deterministic problem: 16 residues, node dim 128, 16 chi bins, chi_idx=2.
    N, D, B, CHI_IDX = 16, 128, 16, 2
    C_PREV = B * CHI_IDX
    BIN_MIN, BIN_WIDTH = -180.0, 360.0 / B

    key = jax.random.PRNGKey(0)
    ks = jax.random.split(key, 11)

    def linear(kw, kb, fan_in, fan_out):
        w = jax.random.normal(kw, (fan_in, fan_out), jnp.float32) / jnp.sqrt(float(fan_in))
        b = 0.1 * jax.random.normal(kb, (fan_out,), jnp.float32)
        return w, b

    w1, b1 = linear(ks[0], ks[1], D + C_PREV, D)
    w2, b2 = linear(ks[2], ks[3], D, D)
    w3, b3 = linear(ks[4], ks[5], D, D)
    wo, bo = linear(ks[6], ks[7], D, B)
    params = dict(w1=w1, b1=b1, w2=w2, b2=b2, w3=w3, b3=b3, wo=wo, bo=bo)

    bb_nodes = jax.random.normal(ks[8], (N, D), jnp.float32)
    prev_chi = jax.random.uniform(ks[9], (N, C_PREV), jnp.float32)
    true_chi = jax.random.uniform(ks[10], (N, 4), jnp.float32,
                                  minval=-180.0, maxval=180.0)
    true_chi = true_chi.at[3, CHI_IDX].set(jnp.nan)   # exercise .nan_to_num()

    # ---- Pallas forward (teacher-forced) ----
    chi_cat, logits, angle, bb_out = jax.block_until_ready(
        dense_chi_layer(bb_nodes, prev_chi, true_chi, params,
                        num_chi_bins=B, chi_idx=CHI_IDX, teacher_force=True))

    # ---- pure-JAX reference (same GELU / basis-function definitions) ----
    def gelu(x):
        return 0.5 * x * (1.0 + jnp.tanh(_SQRT_2_OVER_PI * (x + 0.044715 * x ** 3)))

    centers = BIN_MIN + BIN_WIDTH * jnp.arange(B, dtype=jnp.float32)

    def encode(ang):                                  # ang: (N, 1) degrees
        d = ang - centers[None, :]
        d = d - 360.0 * jnp.floor((d + 180.0) / 360.0)
        return jnp.nan_to_num(jnp.exp(-(d * d) / (BIN_WIDTH * BIN_WIDTH)))

    h = gelu(jnp.concatenate([bb_nodes, prev_chi], axis=1) @ w1 + b1)
    h = gelu(h @ w2 + b2)
    ref_bb = h @ w3 + b3
    ref_logits = gelu(ref_bb) @ wo + bo
    ref_enc = encode(true_chi[:, CHI_IDX:CHI_IDX + 1])
    ref_cat = jnp.concatenate([prev_chi, ref_enc], axis=1)

    assert chi_cat.shape == (N, C_PREV + B)
    assert logits.shape == (N, B)
    assert angle.shape == (N,)
    assert bb_out.shape == (N, D)
    assert jnp.allclose(bb_out, ref_bb, rtol=1e-3, atol=1e-3)
    assert jnp.allclose(logits, ref_logits, rtol=1e-3, atol=1e-3)
    assert jnp.allclose(chi_cat, ref_cat, rtol=1e-3, atol=1e-3)
    # argmax/degree-lookup check against the kernel's own logits (avoids tie flips).
    assert jnp.allclose(angle, centers[jnp.argmax(logits, axis=-1)])

    # ---- non-teacher-forced path: encoding must use the predicted angle ----
    chi_cat2, _, angle2, _ = jax.block_until_ready(
        dense_chi_layer(bb_nodes, prev_chi, true_chi, params,
                        num_chi_bins=B, chi_idx=CHI_IDX, teacher_force=False))
    assert jnp.allclose(chi_cat2[:, C_PREV:], encode(angle2[:, None]),
                        rtol=1e-3, atol=1e-3)

    print("KERNEL_OK")
</pallas_src>

<mosaic_0001>
module attributes {stable_mosaic.version = 11 : i64} {
  func.func @_dense_chi_kernel(%arg0: i32, %arg1: memref<16x128xf32, #tpu.memory_space<vmem>>, %arg2: memref<16x32xf32, #tpu.memory_space<vmem>>, %arg3: memref<16x1xf32, #tpu.memory_space<vmem>>, %arg4: memref<128x128xf32, #tpu.memory_space<vmem>>, %arg5: memref<32x128xf32, #tpu.memory_space<vmem>>, %arg6: memref<1x128xf32, #tpu.memory_space<vmem>>, %arg7: memref<128x128xf32, #tpu.memory_space<vmem>>, %arg8: memref<1x128xf32, #tpu.memory_space<vmem>>, %arg9: memref<128x128xf32, #tpu.memory_space<vmem>>, %arg10: memref<1x128xf32, #tpu.memory_space<vmem>>, %arg11: memref<128x16xf32, #tpu.memory_space<vmem>>, %arg12: memref<1x16xf32, #tpu.memory_space<vmem>>, %arg13: memref<16x48xf32, #tpu.memory_space<vmem>>, %arg14: memref<16x16xf32, #tpu.memory_space<vmem>>, %arg15: memref<16x1xf32, #tpu.memory_space<vmem>>, %arg16: memref<16x128xf32, #tpu.memory_space<vmem>>) attributes {dimension_semantics = [#tpu.dimension_semantics<parallel>], iteration_bounds = array<i64: 1>, scalar_prefetch = 0 : i64, scratch_operands = 0 : i64, tpu.core_type = #tpu.core_type<tc>, window_params = [{transform_indices = @transform_0, window_bounds = array<i64: 16, 128>}, {transform_indices = @transform_1, window_bounds = array<i64: 16, 32>}, {transform_indices = @transform_2, window_bounds = array<i64: 16, 1>}, {pipeline_mode = #tpu.pipeline_mode<synchronous>, transform_indices = @transform_3, window_bounds = array<i64: 128, 128>}, {pipeline_mode = #tpu.pipeline_mode<synchronous>, transform_indices = @transform_4, window_bounds = array<i64: 32, 128>}, {pipeline_mode = #tpu.pipeline_mode<synchronous>, transform_indices = @transform_5, window_bounds = array<i64: 1, 128>}, {pipeline_mode = #tpu.pipeline_mode<synchronous>, transform_indices = @transform_6, window_bounds = array<i64: 128, 128>}, {pipeline_mode = #tpu.pipeline_mode<synchronous>, transform_indices = @transform_7, window_bounds = array<i64: 1, 128>}, {pipeline_mode = #tpu.pipeline_mode<synchronous>, transform_indices = @transform_8, window_bounds = array<i64: 128, 128>}, {pipeline_mode = #tpu.pipeline_mode<synchronous>, transform_indices = @transform_9, window_bounds = array<i64: 1, 128>}, {pipeline_mode = #tpu.pipeline_mode<synchronous>, transform_indices = @transform_10, window_bounds = array<i64: 128, 16>}, {pipeline_mode = #tpu.pipeline_mode<synchronous>, transform_indices = @transform_11, window_bounds = array<i64: 1, 16>}, {transform_indices = @transform_12, window_bounds = array<i64: 16, 48>}, {transform_indices = @transform_13, window_bounds = array<i64: 16, 16>}, {transform_indices = @transform_14, window_bounds = array<i64: 16, 1>}, {transform_indices = @transform_15, window_bounds = array<i64: 16, 128>}]} {
    %c0 = arith.constant 0 : index
    %c0_0 = arith.constant 0 : index
    %0 = vector.load %arg1[%c0, %c0_0] : memref<16x128xf32, #tpu.memory_space<vmem>>, vector<16x128xf32>
    %c0_1 = arith.constant 0 : index
    %c0_2 = arith.constant 0 : index
    %1 = vector.load %arg2[%c0_1, %c0_2] : memref<16x32xf32, #tpu.memory_space<vmem>>, vector<16x32xf32>
    %c0_3 = arith.constant 0 : index
    %c0_4 = arith.constant 0 : index
    %2 = vector.load %arg4[%c0_3, %c0_4] : memref<128x128xf32, #tpu.memory_space<vmem>>, vector<128x128xf32>
    %cst = arith.constant dense<0.000000e+00> : vector<16x128xf32>
    %3 = tpu.matmul %0, %2, %cst {dimension_numbers = #tpu.dot_dimension_numbers<[1], [0], [0], [1], [0, 0, 1, 1], [], []>, precision = #tpu.contract_precision<fp32>} : vector<16x128xf32>, vector<128x128xf32>, vector<16x128xf32> -> vector<16x128xf32>
    %c0_5 = arith.constant 0 : index
    %c0_6 = arith.constant 0 : index
    %4 = vector.load %arg5[%c0_5, %c0_6] : memref<32x128xf32, #tpu.memory_space<vmem>>, vector<32x128xf32>
    %cst_7 = arith.constant dense<0.000000e+00> : vector<16x128xf32>
    %5 = tpu.matmul %1, %4, %cst_7 {dimension_numbers = #tpu.dot_dimension_numbers<[1], [0], [0], [1], [0, 0, 1, 1], [], []>, precision = #tpu.contract_precision<fp32>} : vector<16x32xf32>, vector<32x128xf32>, vector<16x128xf32> -> vector<16x128xf32>
    %6 = arith.addf %3, %5 : vector<16x128xf32>
    %c0_8 = arith.constant 0 : index
    %c0_9 = arith.constant 0 : index
    %7 = vector.load %arg6[%c0_8, %c0_9] : memref<1x128xf32, #tpu.memory_space<vmem>>, vector<1x128xf32>
    %8 = vector.broadcast %7 : vector<1x128xf32> to vector<16x128xf32>
    %9 = arith.addf %6, %8 : vector<16x128xf32>
    %cst_10 = arith.constant 5.000000e-01 : f32
    %10 = vector.broadcast %cst_10 : f32 to vector<16x128xf32>
    %11 = arith.mulf %10, %9 : vector<16x128xf32>
    %cst_11 = arith.constant 4.471500e-02 : f32
    %12 = vector.broadcast %cst_11 : f32 to vector<16x128xf32>
    %13 = arith.mulf %12, %9 : vector<16x128xf32>
    %14 = arith.mulf %13, %9 : vector<16x128xf32>
    %15 = arith.mulf %14, %9 : vector<16x128xf32>
    %16 = arith.addf %9, %15 : vector<16x128xf32>
    %cst_12 = arith.constant 0.797884583 : f32
    %17 = vector.broadcast %cst_12 : f32 to vector<16x128xf32>
    %18 = arith.mulf %17, %16 : vector<16x128xf32>
    %19 = math.tanh %18 : vector<16x128xf32>
    %cst_13 = arith.constant 1.000000e+00 : f32
    %20 = vector.broadcast %cst_13 : f32 to vector<16x128xf32>
    %21 = arith.addf %20, %19 : vector<16x128xf32>
    %22 = arith.mulf %11, %21 : vector<16x128xf32>
    %c0_14 = arith.constant 0 : index
    %c0_15 = arith.constant 0 : index
    %23 = vector.load %arg7[%c0_14, %c0_15] : memref<128x128xf32, #tpu.memory_space<vmem>>, vector<128x128xf32>
    %cst_16 = arith.constant dense<0.000000e+00> : vector<16x128xf32>
    %24 = tpu.matmul %22, %23, %cst_16 {dimension_numbers = #tpu.dot_dimension_numbers<[1], [0], [0], [1], [0, 0, 1, 1], [], []>, precision = #tpu.contract_precision<fp32>} : vector<16x128xf32>, vector<128x128xf32>, vector<16x128xf32> -> vector<16x128xf32>
    %c0_17 = arith.constant 0 : index
    %c0_18 = arith.constant 0 : index
    %25 = vector.load %arg8[%c0_17, %c0_18] : memref<1x128xf32, #tpu.memory_space<vmem>>, vector<1x128xf32>
    %26 = vector.broadcast %25 : vector<1x128xf32> to vector<16x128xf32>
    %27 = arith.addf %24, %26 : vector<16x128xf32>
    %cst_19 = arith.constant 5.000000e-01 : f32
    %28 = vector.broadcast %cst_19 : f32 to vector<16x128xf32>
    %29 = arith.mulf %28, %27 : vector<16x128xf32>
    %cst_20 = arith.constant 4.471500e-02 : f32
    %30 = vector.broadcast %cst_20 : f32 to vector<16x128xf32>
    %31 = arith.mulf %30, %27 : vector<16x128xf32>
    %32 = arith.mulf %31, %27 : vector<16x128xf32>
    %33 = arith.mulf %32, %27 : vector<16x128xf32>
    %34 = arith.addf %27, %33 : vector<16x128xf32>
    %cst_21 = arith.constant 0.797884583 : f32
    %35 = vector.broadcast %cst_21 : f32 to vector<16x128xf32>
    %36 = arith.mulf %35, %34 : vector<16x128xf32>
    %37 = math.tanh %36 : vector<16x128xf32>
    %cst_22 = arith.constant 1.000000e+00 : f32
    %38 = vector.broadcast %cst_22 : f32 to vector<16x128xf32>
    %39 = arith.addf %38, %37 : vector<16x128xf32>
    %40 = arith.mulf %29, %39 : vector<16x128xf32>
    %c0_23 = arith.constant 0 : index
    %c0_24 = arith.constant 0 : index
    %41 = vector.load %arg9[%c0_23, %c0_24] : memref<128x128xf32, #tpu.memory_space<vmem>>, vector<128x128xf32>
    %cst_25 = arith.constant dense<0.000000e+00> : vector<16x128xf32>
    %42 = tpu.matmul %40, %41, %cst_25 {dimension_numbers = #tpu.dot_dimension_numbers<[1], [0], [0], [1], [0, 0, 1, 1], [], []>, precision = #tpu.contract_precision<fp32>} : vector<16x128xf32>, vector<128x128xf32>, vector<16x128xf32> -> vector<16x128xf32>
    %c0_26 = arith.constant 0 : index
    %c0_27 = arith.constant 0 : index
    %43 = vector.load %arg10[%c0_26, %c0_27] : memref<1x128xf32, #tpu.memory_space<vmem>>, vector<1x128xf32>
    %44 = vector.broadcast %43 : vector<1x128xf32> to vector<16x128xf32>
    %45 = arith.addf %42, %44 : vector<16x128xf32>
    %cst_28 = arith.constant 5.000000e-01 : f32
    %46 = vector.broadcast %cst_28 : f32 to vector<16x128xf32>
    %47 = arith.mulf %46, %45 : vector<16x128xf32>
    %cst_29 = arith.constant 4.471500e-02 : f32
    %48 = vector.broadcast %cst_29 : f32 to vector<16x128xf32>
    %49 = arith.mulf %48, %45 : vector<16x128xf32>
    %50 = arith.mulf %49, %45 : vector<16x128xf32>
    %51 = arith.mulf %50, %45 : vector<16x128xf32>
    %52 = arith.addf %45, %51 : vector<16x128xf32>
    %cst_30 = arith.constant 0.797884583 : f32
    %53 = vector.broadcast %cst_30 : f32 to vector<16x128xf32>
    %54 = arith.mulf %53, %52 : vector<16x128xf32>
    %55 = math.tanh %54 : vector<16x128xf32>
    %cst_31 = arith.constant 1.000000e+00 : f32
    %56 = vector.broadcast %cst_31 : f32 to vector<16x128xf32>
    %57 = arith.addf %56, %55 : vector<16x128xf32>
    %58 = arith.mulf %47, %57 : vector<16x128xf32>
    %c0_32 = arith.constant 0 : index
    %c0_33 = arith.constant 0 : index
    %59 = vector.load %arg11[%c0_32, %c0_33] : memref<128x16xf32, #tpu.memory_space<vmem>>, vector<128x16xf32>
    %cst_34 = arith.constant dense<0.000000e+00> : vector<16x16xf32>
    %60 = tpu.matmul %58, %59, %cst_34 {dimension_numbers = #tpu.dot_dimension_numbers<[1], [0], [0], [1], [0, 0, 1, 1], [], []>, precision = #tpu.contract_precision<fp32>} : vector<16x128xf32>, vector<128x16xf32>, vector<16x16xf32> -> vector<16x16xf32>
    %c0_35 = arith.constant 0 : index
    %c0_36 = arith.constant 0 : index
    %61 = vector.load %arg12[%c0_35, %c0_36] : memref<1x16xf32, #tpu.memory_space<vmem>>, vector<1x16xf32>
    %62 = vector.broadcast %61 : vector<1x16xf32> to vector<16x16xf32>
    %63 = arith.addf %60, %62 : vector<16x16xf32>
    %cst_37 = arith.constant dense<0xFF800000> : vector<16xf32>
    %64 = vector.multi_reduction <maximumf>, %63, %cst_37 [1] : vector<16x16xf32> to vector<16xf32>
    %65 = vector.shape_cast %64 : vector<16xf32> to vector<16x1xf32>
    %66 = tpu.iota {dimensions = array<i32: 1>} : vector<16x16xi32>
    %67 = vector.broadcast %65 : vector<16x1xf32> to vector<16x16xf32>
    %68 = arith.cmpf oeq, %63, %67 : vector<16x16xf32>
    %c16_i32 = arith.constant 16 : i32
    %69 = vector.broadcast %c16_i32 : i32 to vector<16x16xi32>
    %70 = arith.select %68, %66, %69 : vector<16x16xi1>, vector<16x16xi32>
    %cst_38 = arith.constant dense<2147483647> : vector<16xi32>
    %71 = vector.multi_reduction <minsi>, %70, %cst_38 [1] : vector<16x16xi32> to vector<16xi32>
    %72 = vector.shape_cast %71 : vector<16xi32> to vector<16x1xi32>
    %73 = arith.sitofp %72 : vector<16x1xi32> to vector<16x1xf32>
    %cst_39 = arith.constant 2.250000e+01 : f32
    %74 = vector.broadcast %cst_39 : f32 to vector<16x1xf32>
    %75 = arith.mulf %73, %74 : vector<16x1xf32>
    %cst_40 = arith.constant -1.800000e+02 : f32
    %76 = vector.broadcast %cst_40 : f32 to vector<16x1xf32>
    %77 = arith.addf %76, %75 : vector<16x1xf32>
    %c0_41 = arith.constant 0 : index
    %c0_42 = arith.constant 0 : index
    %78 = vector.load %arg3[%c0_41, %c0_42] : memref<16x1xf32, #tpu.memory_space<vmem>>, vector<16x1xf32>
    %79 = tpu.iota {dimensions = array<i32: 1>} : vector<16x16xi32>
    %80 = arith.sitofp %79 : vector<16x16xi32> to vector<16x16xf32>
    %cst_43 = arith.constant 2.250000e+01 : f32
    %81 = vector.broadcast %cst_43 : f32 to vector<16x16xf32>
    %82 = arith.mulf %81, %80 : vector<16x16xf32>
    %cst_44 = arith.constant -1.800000e+02 : f32
    %83 = vector.broadcast %cst_44 : f32 to vector<16x16xf32>
    %84 = arith.addf %83, %82 : vector<16x16xf32>
    %85 = vector.broadcast %78 : vector<16x1xf32> to vector<16x16xf32>
    %86 = arith.subf %85, %84 : vector<16x16xf32>
    %cst_45 = arith.constant 1.800000e+02 : f32
    %87 = vector.broadcast %cst_45 : f32 to vector<16x16xf32>
    %88 = arith.addf %86, %87 : vector<16x16xf32>
    %cst_46 = arith.constant 3.600000e+02 : f32
    %89 = vector.broadcast %cst_46 : f32 to vector<16x16xf32>
    %90 = arith.divf %88, %89 : vector<16x16xf32>
    %91 = math.floor %90 : vector<16x16xf32>
    %cst_47 = arith.constant 3.600000e+02 : f32
    %92 = vector.broadcast %cst_47 : f32 to vector<16x16xf32>
    %93 = arith.mulf %92, %91 : vector<16x16xf32>
    %94 = arith.subf %86, %93 : vector<16x16xf32>
    %95 = arith.mulf %94, %94 : vector<16x16xf32>
    %cst_48 = arith.constant 0.000000e+00 : f32
    %96 = vector.broadcast %cst_48 : f32 to vector<16x16xf32>
    %97 = arith.subf %96, %95 : vector<16x16xf32>
    %cst_49 = arith.constant 0.00197530864 : f32
    %98 = vector.broadcast %cst_49 : f32 to vector<16x16xf32>
    %99 = arith.mulf %97, %98 : vector<16x16xf32>
    %100 = math.exp %99 : vector<16x16xf32>
    %101 = arith.cmpf one, %100, %100 : vector<16x16xf32>
    %cst_50 = arith.constant 0.000000e+00 : f32
    %102 = vector.broadcast %cst_50 : f32 to vector<16x16xf32>
    %103 = arith.select %101, %102, %100 : vector<16x16xi1>, vector<16x16xf32>
    %c0_51 = arith.constant 0 : index
    %c0_52 = arith.constant 0 : index
    %104 = vector.load %arg13[%c0_51, %c0_52] : memref<16x48xf32, #tpu.memory_space<vmem>>, vector<16x32xf32>
    tpu.vector_store %arg13[%c0_51, %c0_52], %1 {strides = array<i32>} : memref<16x48xf32, #tpu.memory_space<vmem>>, vector<16x32xf32>,
    %c0_53 = arith.constant 0 : index
    %c32 = arith.constant 32 : index
    %105 = vector.load %arg13[%c0_53, %c32] : memref<16x48xf32, #tpu.memory_space<vmem>>, vector<16x16xf32>
    tpu.vector_store %arg13[%c0_53, %c32], %103 {strides = array<i32>} : memref<16x48xf32, #tpu.memory_space<vmem>>, vector<16x16xf32>,
    %c0_54 = arith.constant 0 : index
    %c0_55 = arith.constant 0 : index
    %106 = vector.load %arg14[%c0_54, %c0_55] : memref<16x16xf32, #tpu.memory_space<vmem>>, vector<16x16xf32>
    tpu.vector_store %arg14[%c0_54, %c0_55], %63 {strides = array<i32>} : memref<16x16xf32, #tpu.memory_space<vmem>>, vector<16x16xf32>,
    %c0_56 = arith.constant 0 : index
    %c0_57 = arith.constant 0 : index
    %107 = vector.load %arg15[%c0_56, %c0_57] : memref<16x1xf32, #tpu.memory_space<vmem>>, vector<16x1xf32>
    tpu.vector_store %arg15[%c0_56, %c0_57], %77 {strides = array<i32>} : memref<16x1xf32, #tpu.memory_space<vmem>>, vector<16x1xf32>,
    %c0_58 = arith.constant 0 : index
    %c0_59 = arith.constant 0 : index
    %108 = vector.load %arg16[%c0_58, %c0_59] : memref<16x128xf32, #tpu.memory_space<vmem>>, vector<16x128xf32>
    tpu.vector_store %arg16[%c0_58, %c0_59], %45 {strides = array<i32>} : memref<16x128xf32, #tpu.memory_space<vmem>>, vector<16x128xf32>,
    return
  }
  func.func @transform_0(%arg0: i32) -> (i32, i32) {
    %c0_i32 = arith.constant 0 : i32
    %c0_i32_0 = arith.constant 0 : i32
    return %arg0, %c0_i32 : i32, i32
  }
  func.func @transform_1(%arg0: i32) -> (i32, i32) {
    %c0_i32 = arith.constant 0 : i32
    %c0_i32_0 = arith.constant 0 : i32
    return %arg0, %c0_i32 : i32, i32
  }
  func.func @transform_2(%arg0: i32) -> (i32, i32) {
    %c0_i32 = arith.constant 0 : i32
    %c0_i32_0 = arith.constant 0 : i32
    return %arg0, %c0_i32 : i32, i32
  }
  func.func @transform_3(%arg0: i32) -> (i32, i32) {
    %c0_i32 = arith.constant 0 : i32
    %c0_i32_0 = arith.constant 0 : i32
    %c0_i32_1 = arith.constant 0 : i32
    return %c0_i32, %c0_i32_0 : i32, i32
  }
  func.func @transform_4(%arg0: i32) -> (i32, i32) {
    %c0_i32 = arith.constant 0 : i32
    %c0_i32_0 = arith.constant 0 : i32
    %c0_i32_1 = arith.constant 0 : i32
    return %c0_i32, %c0_i32_0 : i32, i32
  }
  func.func @transform_5(%arg0: i32) -> (i32, i32) {
    %c0_i32 = arith.constant 0 : i32
    %c0_i32_0 = arith.constant 0 : i32
    %c0_i32_1 = arith.constant 0 : i32
    return %c0_i32, %c0_i32_0 : i32, i32
  }
  func.func @transform_6(%arg0: i32) -> (i32, i32) {
    %c0_i32 = arith.constant 0 : i32
    %c0_i32_0 = arith.constant 0 : i32
    %c0_i32_1 = arith.constant 0 : i32
    return %c0_i32, %c0_i32_0 : i32, i32
  }
  func.func @transform_7(%arg0: i32) -> (i32, i32) {
    %c0_i32 = arith.constant 0 : i32
    %c0_i32_0 = arith.constant 0 : i32
    %c0_i32_1 = arith.constant 0 : i32
    return %c0_i32, %c0_i32_0 : i32, i32
  }
  func.func @transform_8(%arg0: i32) -> (i32, i32) {
    %c0_i32 = arith.constant 0 : i32
    %c0_i32_0 = arith.constant 0 : i32
    %c0_i32_1 = arith.constant 0 : i32
    return %c0_i32, %c0_i32_0 : i32, i32
  }
  func.func @transform_9(%arg0: i32) -> (i32, i32) {
    %c0_i32 = arith.constant 0 : i32
    %c0_i32_0 = arith.constant 0 : i32
    %c0_i32_1 = arith.constant 0 : i32
    return %c0_i32, %c0_i32_0 : i32, i32
  }
  func.func @transform_10(%arg0: i32) -> (i32, i32) {
    %c0_i32 = arith.constant 0 : i32
    %c0_i32_0 = arith.constant 0 : i32
    %c0_i32_1 = arith.constant 0 : i32
    return %c0_i32, %c0_i32_0 : i32, i32
  }
  func.func @transform_11(%arg0: i32) -> (i32, i32) {
    %c0_i32 = arith.constant 0 : i32
    %c0_i32_0 = arith.constant 0 : i32
    %c0_i32_1 = arith.constant 0 : i32
    return %c0_i32, %c0_i32_0 : i32, i32
  }
  func.func @transform_12(%arg0: i32) -> (i32, i32) {
    %c0_i32 = arith.constant 0 : i32
    %c0_i32_0 = arith.constant 0 : i32
    return %arg0, %c0_i32 : i32, i32
  }
  func.func @transform_13(%arg0: i32) -> (i32, i32) {
    %c0_i32 = arith.constant 0 : i32
    %c0_i32_0 = arith.constant 0 : i32
    return %arg0, %c0_i32 : i32, i32
  }
  func.func @transform_14(%arg0: i32) -> (i32, i32) {
    %c0_i32 = arith.constant 0 : i32
    %c0_i32_0 = arith.constant 0 : i32
    return %arg0, %c0_i32 : i32, i32
  }
  func.func @transform_15(%arg0: i32) -> (i32, i32) {
    %c0_i32 = arith.constant 0 : i32
    %c0_i32_0 = arith.constant 0 : i32
    return %arg0, %c0_i32 : i32, i32
  }
}

</mosaic_0001>

<bundles_post_ra>
// kernel: tpu_custom_call.1
= control target key start
LH: loop header
LB: loop body
LE: loop exit
PB: predicated region body
PF: predicated region fallthrough
CT: control target
= control target key end

     0   :  { %21 = vsyncpa [#allocation3], 0  ;;  %s3676_s0 = inlined_call_operand.vmem [shape: f32[16,128], index: 0, kind: input, shape index: {}]   ;;  %s3677_s1 = inlined_call_operand.hbm [shape: f32[16,32], index: 1, kind: input, shape index: {}]   ;;  %s3678_s2 = inlined_call_operand.vmem [shape: f32[16,1], index: 2, kind: input, shape index: {}]   ;;  %s3679_s3 = inlined_call_operand.vmem [shape: f32[128,128], index: 3, kind: input, shape index: {}]   ;;  %s3680_s4 = inlined_call_operand.hbm [shape: f32[32,128], index: 4, kind: input, shape index: {}]   ;;  %s3681_s5 = inlined_call_operand.vmem [shape: f32[1,128], index: 5, kind: input, shape index: {}]   ;;  %s3682_s6 = inlined_call_operand.hbm [shape: f32[128,128], index: 6, kind: input, shape index: {}]   ;;  %s3683_s7 = inlined_call_operand.vmem [shape: f32[1,128], index: 7, kind: input, shape index: {}]   ;;  %s3684_s8 = inlined_call_operand.hbm [shape: f32[128,128], index: 8, kind: input, shape index: {}]   ;;  %s3685_s9 = inlined_call_operand.vmem [shape: f32[1,128], index: 9, kind: input, shape index: {}]   ;;  %s3686_s10 = inlined_call_operand.vmem [shape: f32[128,16], index: 10, kind: input, shape index: {}]   ;;  %s3687_s11 = inlined_call_operand.vmem [shape: f32[1,16], index: 11, kind: input, shape index: {}]   ;;  %s3688_s12 = inlined_call_operand.hbm [shape: f32[16,48], index: 12, kind: output, shape index: {0}]   ;;  %s3689_s13 = inlined_call_operand.hbm [shape: f32[16,16], index: 13, kind: output, shape index: {1}]   ;;  %s3690_s14 = inlined_call_operand.vmem [shape: f32[16,1], index: 14, kind: output, shape index: {2}]   ;;  %s3691_s15 = inlined_call_operand.hbm [shape: f32[16,128], index: 15, kind: output, shape index: {3}]  }
   0x1   :  { %22 = vsyncpa [#allocation6], 0 }
   0x2   :  { %23 = vsyncpa [#allocation9], 0 }
   0x3   :  { %24 = vsyncpa [#allocation4], 0 }
   0x4   :  { %25 = vsyncpa [#allocation12], 0  ;;  %s49_s20 = sshll.u32 %s3680_s4, 4  ;;  %s2364_s21 = smov [#allocation5]   ;;  %s50_s20 = int_to_ptr.hbm [resolvable:$true] %s49_s20 }
   0x5   :  { %s51_s22 = sshll.u32 %s2364_s21, 4  ;;  %s32_s25 = sshll.u32 %s3677_s1, 4  ;;  %s52_s22 = int_to_ptr.vmem [resolvable:$true] %s51_s22  ;;  %s33_s25 = int_to_ptr.hbm [resolvable:$true] %s32_s25 }
   0x6   :  { %s2365_s26 = smov 128   ;;  %s2366_s27 = smov 8  }
   0x7   :  { %57 = dma.hbm_to_vmem [thread:$0]  %s50_s20, 512, %s52_s22, [#allocation6], %s2365_s26, %s2365_s26, %s2366_s27  }
   0x8   :  { %s2367_s28 = smov [#allocation2]   ;;  %s64_s4 = sshll.u32 %s3682_s6, 4  ;;  %s65_s4 = int_to_ptr.hbm [resolvable:$true] %s64_s4 }
   0x9   :  { %s34_s29 = sshll.u32 %s2367_s28, 4  ;;  %s79_s18 = sshll.u32 %s3684_s8, 4  ;;  %s35_s29 = int_to_ptr.vmem [resolvable:$true] %s34_s29  ;;  %s80_s18 = int_to_ptr.hbm [resolvable:$true] %s79_s18 }
   0xa   :  { %40 = dma.hbm_to_vmem [thread:$0]  %s33_s25, 256, %s35_s29, [#allocation3], %s2365_s26, %s2365_s26, %s2366_s27  }
   0xb   :  { %s2368_s19 = smov [#allocation7]   ;;  %s2369_s20 = smov [#allocation8]  }
   0xc   :  { %s66_s21 = sshll.u32 %s2368_s19, 4  ;;  %s81_s6 = sshll.u32 %s2369_s20, 4  ;;  %s67_s21 = int_to_ptr.vmem [resolvable:$true] %s66_s21  ;;  %s82_s6 = int_to_ptr.vmem [resolvable:$true] %s81_s6 }
   0xd   :  { %72 = dma.hbm_to_vmem [thread:$0]  %s65_s4, 2048, %s67_s21, [#allocation6], %s2365_s26, %s2365_s26, %s2366_s27  }
   0xe   :  { %87 = dma.hbm_to_vmem [thread:$0]  %s80_s18, 2048, %s82_s6, [#allocation9], %s2365_s26, %s2365_s26, %s2366_s27  }
   0xf   :  { %2354 = dma.done.wait [#allocation3], 256  }
  0x10   :  { %2355 = vsyncadd [#allocation3], 4294967040 }
  0x11   :  { %2356 = dma.done.wait [#allocation6], 2560  }
  0x12   :  { %2357 = vsyncadd [#allocation6], 4294964736 }
  0x13   :  { %2358 = dma.done.wait [#allocation9], 2048  }
  0x14   :  { %2359 = vsyncadd [#allocation9], 4294965248  ;;  %vm134_vm0 = vcmask 261120   ;;  %v133_v0 = vld [vmem:[#allocation5 + $0x18] sm:$0xff]  ;;  %v132_v1 = vld [vmem:[#allocation5 + $0x10] sm:$0xff]  ;;  %vm1965_vm1 = vcmask 130048  }
  0x15   :  { %v131_v2 = vld [vmem:[#allocation5 + $0x8] sm:$0xff]  ;;  %v2480_v3 = vand.u32 4294901760, %v133_v0  ;;  %v2482_v4 = vand.u32 4294901760, %v132_v1  ;;  %v130_v6 = vld [vmem:[#allocation5] sm:$0xff]  ;;  %v113_v7 = vld [vmem:[#allocation2 + $0x8] sm:$0xff]  ;;  %s2101_s23 = sshll.u32 %s3689_s13, 4  ;;  %s2102_s23 = int_to_ptr.hbm [resolvable:$true] %s2101_s23 }
  0x16   :  { %v2484_v5 = vand.u32 4294901760, %v131_v2  ;;  %v2486_v8 = vand.u32 4294901760, %v130_v6  ;;  %v139_v9 = vsel %vm134_vm0, %v113_v7, 0  ;;  %2063 = vst.msk [vmem:[#allocation10 + $0x8] sm:$0xff] %vm134_vm0, %v113_v7  ;;  %v112_v10 = vld [vmem:[#allocation2] sm:$0xff]  ;;  %v129_v15 = vld [vmem:[%s3679_s3 + $0x78] sm:$0xff] }
  0x17   :  { %2142 = vmatpush.msra.mxu2 %v2480_v3  ;;  %v191_v11 = vsub.f32 %v133_v0, %v2480_v3  ;;  %v2492_v12 = vand.u32 4294901760, %v139_v9  ;;  %v197_v13 = vsub.f32 %v132_v1, %v2482_v4  ;;  %154 = vmatpush.msra.mxu0 %v2480_v3  ;;  %v136_v17 = vsel %vm134_vm0, %v112_v10, 0  ;;  %2062 = vst.msk [vmem:[#allocation10] sm:$0xff] %vm134_vm0, %v112_v10  ;;  %v128_v22 = vld [vmem:[%s3679_s3 + $0x70] sm:$0xff]  ;;  %v127_v30 = vld [vmem:[%s3679_s3 + $0x68] sm:$0xff]  ;;  %v126_v37 = vld [vmem:[%s3679_s3 + $0x60] sm:$0xff] }
  0x18   :  { %v203_v14 = vsub.f32 %v131_v2, %v2484_v5  ;;  %v2501_v16 = vsub.f32 %v130_v6, %v2486_v8  ;;  %v2514_v24 = vand.u32 4294901760, %v129_v15  ;;  %v2516_v25 = vand.u32 4294901760, %v136_v17  ;;  %v125_v43 = vld [vmem:[%s3679_s3 + $0x58] sm:$0xff]  ;;  %v124_v48 = vld [vmem:[%s3679_s3 + $0x50] sm:$0xff]  ;;  %v123_v53 = vld [vmem:[%s3679_s3 + $0x48] sm:$0xff]  ;;  %s2116_s29 = sshll.u32 %s3691_s15, 4  ;;  %s2117_s29 = int_to_ptr.hbm [resolvable:$true] %s2116_s29 }
  0x19   :  { %2143 = vmatpush.msra.mxu2 %v2482_v4  ;;  %v192_v18 = vand.u32 4294901760, %v191_v11  ;;  %v2507_v19 = vsub.f32 %v139_v9, %v2492_v12  ;;  %v198_v20 = vand.u32 4294901760, %v197_v13  ;;  %156 = vmatpush.msra.mxu0 %v2482_v4  ;;  %v2524_v31 = vand.u32 4294901760, %v128_v22  ;;  %v122_v57 = vld [vmem:[%s3679_s3 + $0x40] sm:$0xff]  ;;  %v121_v61 = vld [vmem:[%s3679_s3 + $0x38] sm:$0xff]  ;;  %v120_v2 = vld [vmem:[%s3679_s3 + $0x30] sm:$0xff] }
  0x1a   :  { %v204_v21 = vand.u32 4294901760, %v203_v14  ;;  %v210_v23 = vand.u32 4294901760, %v2501_v16  ;;  %v2527_v32 = vsub.f32 %v136_v17, %v2516_v25  ;;  %v2541_v38 = vsub.f32 %v129_v15, %v2514_v24  ;;  %v119_v15 = vld [vmem:[%s3679_s3 + $0x28] sm:$0xff]  ;;  %s2375_s30 = smov [#allocation10]   ;;  %s2088_s17 = sshll.u32 %s3688_s12, 4  ;;  %s2089_s17 = int_to_ptr.hbm [resolvable:$true] %s2088_s17 }
  0x1b   :  { %2144 = vmatpush.msra.mxu2 %v2484_v5  ;;  %v193_v26 = vsub.f32 %v191_v11, %v192_v18  ;;  %v171_v27 = vand.u32 4294901760, %v2507_v19  ;;  %v199_v28 = vsub.f32 %v197_v13, %v198_v20  ;;  %158 = vmatpush.msra.mxu0 %v2484_v5  ;;  %v2543_v39 = vand.u32 4294901760, %v127_v30  ;;  %s2086_s16 = sshll.u32 %s2375_s30, 4  ;;  %s2087_s16 = int_to_ptr.vmem [resolvable:$true] %s2086_s16 }
  0x1c   :  { %v205_v29 = vsub.f32 %v203_v14, %v204_v21  ;;  %v211_v36 = vsub.f32 %v2501_v16, %v210_v23  ;;  %v163_v40 = vand.u32 4294901760, %v2527_v32  ;;  %v2549_v44 = vand.u32 4294901760, %v126_v37 }
  0x1d   :  { %2145 = vmatpush.msra.mxu2 %v2486_v8  ;;  %v194_v33 = vand.u32 4294901760, %v193_v26  ;;  %v172_v34 = vsub.f32 %v2507_v19, %v171_v27  ;;  %v200_v35 = vand.u32 4294901760, %v199_v28  ;;  %160 = vmatpush.msra.mxu0 %v2486_v8  ;;  %v2555_v46 = vsub.f32 %v128_v22, %v2524_v31 }
  0x1e   :  { %v206_v42 = vand.u32 4294901760, %v205_v29  ;;  %v164_v45 = vsub.f32 %v2527_v32, %v163_v40  ;;  %v212_v47 = vand.u32 4294901760, %v211_v36  ;;  %v2560_v49 = vand.u32 4294901760, %v125_v43  ;;  %v110_v29 = vld [vmem:[%s3676_s0] sm:$0xff] }
  0x1f   :  { %237 = vmatpush.msrb.mxu2 %v191_v11  ;;  %306 = vmatpush.msrb.mxu0 %v192_v18  ;;  %v173_v41 = vand.u32 4294901760, %v172_v34  ;;  %v408_v50 = vand.u32 4294901760, %v2541_v38  ;;  %v2564_v52 = vsub.f32 %v127_v30, %v2543_v39  ;;  %v2570_v54 = vand.u32 4294901760, %v124_v48  ;;  %v117_v30 = vld [vmem:[%s3679_s3 + $0x18] sm:$0xff] }
  0x20   :  { %2146 = vmatpush.msra.mxu3 %v194_v33  ;;  %195 = vmatpush.msra.mxu1 %v194_v33  ;;  %v165_v51 = vand.u32 4294901760, %v164_v45  ;;  %v414_v55 = vand.u32 4294901760, %v2555_v46  ;;  %v2574_v56 = vsub.f32 %v126_v37, %v2549_v44  ;;  %v2584_v59 = vand.u32 4294901760, %v123_v53 }
  0x21   :  { %240 = vmatpush.msrb.mxu2 %v197_v13  ;;  %310 = vmatpush.msrb.mxu0 %v198_v20  ;;  %v409_v58 = vsub.f32 %v2541_v38, %v408_v50  ;;  %v420_v60 = vand.u32 4294901760, %v2564_v52  ;;  %v2591_v62 = vsub.f32 %v125_v43, %v2560_v49  ;;  %v2598_v0 = vand.u32 4294901760, %v122_v57 }
  0x22   :  { %174 = vmatmul.f32.vlgmr.msra.gmra.mxu2 %v173_v41  ;;  %2147 = vmatpush.msra.mxu3 %v200_v35  ;;  %v415_v63 = vsub.f32 %v2555_v46, %v414_v55  ;;  %v426_v1 = vand.u32 4294901760, %v2574_v56  ;;  %v2607_v6 = vsub.f32 %v124_v48, %v2570_v54  ;;  %v2611_v7 = vand.u32 4294901760, %v121_v61 }
  0x23   :  { %243 = vmatpush.msrb.mxu2 %v203_v14  ;;  %201 = vmatpush.msra.mxu1 %v200_v35  ;;  %v410_v9 = vand.u32 4294901760, %v409_v58  ;;  %v421_v10 = vsub.f32 %v2564_v52, %v420_v60  ;;  %v432_v11 = vand.u32 4294901760, %v2591_v62  ;;  %v2620_v13 = vsub.f32 %v123_v53, %v2584_v59 }
  0x24   :  { %2148 = vmatpush.msra.mxu3 %v206_v42  ;;  %314 = vmatpush.msrb.mxu0 %v204_v21  ;;  %v2624_v14 = vand.u32 4294901760, %v120_v2  ;;  %v427_v17 = vsub.f32 %v2574_v56, %v426_v1  ;;  %v438_v18 = vand.u32 4294901760, %v2607_v6  ;;  %v2639_v20 = vsub.f32 %v122_v57, %v2598_v0 }
  0x25   :  { %246 = vmatpush.msrb.mxu2 %v2501_v16  ;;  %207 = vmatpush.msra.mxu1 %v206_v42  ;;  %v416_v16 = vand.u32 4294901760, %v415_v63  ;;  %v2644_v21 = vsub.f32 %v121_v61, %v2611_v7  ;;  %v422_v22 = vand.u32 4294901760, %v421_v10  ;;  %v2650_v26 = vand.u32 4294901760, %v119_v15 }
  0x26   :  { %2149 = vmatpush.msra.mxu3 %v212_v47  ;;  %166 = vmatmul.f32.vlgmr.msra.gmra.mxu0 %v165_v51  ;;  %v444_v28 = vand.u32 4294901760, %v2620_v13  ;;  %v428_v33 = vand.u32 4294901760, %v427_v17  ;;  %v439_v34 = vsub.f32 %v2607_v6, %v438_v18  ;;  %v450_v35 = vand.u32 4294901760, %v2639_v20 }
  0x27   :  { %358 = vmatpush.msra.mxu2 %v2514_v24  ;;  %219 = vmatmul.f32.vlgmr.msra.gmra.mxu3 %v2492_v12  ;;  %v456_v36 = vand.u32 4294901760, %v2644_v21  ;;  %v2678_v37 = vand.u32 4294901760, %v110_v29  ;;  %v2684_v42 = vand.u32 4294901760, %v117_v30  ;;  %v2687_v43 = vsub.f32 %v119_v15, %v2650_v26 }
  0x28   :  { %271 = vmatpush.msrb.mxu3 %v2480_v3  ;;  %213 = vmatpush.msra.mxu1 %v212_v47  ;;  %v445_v41 = vsub.f32 %v2620_v13, %v444_v28  ;;  %v115_v47 = vld [vmem:[%s3679_s3 + $0x8] sm:$0xff]  ;;  %v440_v48 = vand.u32 4294901760, %v439_v34  ;;  %v451_v51 = vsub.f32 %v2639_v20, %v450_v35  ;;  %vm2072_vm9 = vcmask 392448  }
  0x29   :  { %360 = vmatpush.msra.mxu2 %v2524_v31  ;;  %318 = vmatpush.msrb.mxu0 %v210_v23  ;;  %v433_v23 = vsub.f32 %v2591_v62, %v432_v11  ;;  %v457_v58 = vsub.f32 %v2644_v21, %v456_v36  ;;  %v2713_v61 = vsub.f32 %v110_v29, %v2678_v37  ;;  %vm2077_vm10 = vcmask 7168  }
  0x2a   :  { %249 = vmatmul.f32.vlgmr.msrb.gmra.mxu2 %v2527_v32  ;;  %273 = vmatpush.msrb.mxu3 %v2482_v4  ;;  %v2673_v32 = vsub.f32 %v120_v2, %v2624_v14  ;;  %v446_v63 = vand.u32 4294901760, %v445_v41  ;;  %v2716_v2 = vand.u32 4294901760, %v115_v47  ;;  %v2720_v10 = vsub.f32 %v117_v30, %v2684_v42 }
  0x2b   :  { %362 = vmatpush.msra.mxu2 %v2543_v39  ;;  %215 = vmatmul.f32.vlgmr.msra.gmra.mxu1 %v2516_v25  ;;  %v452_v17 = vand.u32 4294901760, %v451_v51 }
  0x2c   :  { %275 = vmatpush.msrb.mxu3 %v2484_v5  ;;  %341 = vmatpush.msrb.mxu1 %v2480_v3  ;;  %v118_v3 = vld [vmem:[%s3679_s3 + $0x20] sm:$0xff]  ;;  %v462_v53 = vand.u32 4294901760, %v2673_v32  ;;  %v480_v29 = vand.u32 4294901760, %v2720_v10  ;;  %v2747_v30 = vsub.f32 %v115_v47, %v2716_v2 }
  0x2d   :  { %364 = vmatpush.msra.mxu2 %v2549_v44  ;;  %513 = vmatpush.msra.mxu0 %v2541_v38 }
  0x2e   :  { %277 = vmatpush.msrb.mxu3 %v2486_v8  ;;  %343 = vmatpush.msrb.mxu1 %v2482_v4  ;;  %v2659_v4 = vand.u32 4294901760, %v118_v3  ;;  %v481_v51 = vsub.f32 %v2720_v10, %v480_v29 }
  0x2f   :  { %366 = vmatpush.msra.mxu2 %v2560_v49  ;;  %281 = vmatmul.f32.vlgmr.msrb.gmra.mxu3 %v163_v40  ;;  %v434_v40 = vand.u32 4294901760, %v433_v23 }
  0x30   :  { %411 = vmatpush.msra.mxu3 %v410_v9  ;;  %345 = vmatpush.msrb.mxu1 %v2484_v5  ;;  %v116_v5 = vld [vmem:[%s3679_s3 + $0x10] sm:$0xff]  ;;  %v2705_v57 = vsub.f32 %v118_v3, %v2659_v4  ;;  %v468_v9 = vand.u32 4294901760, %v2687_v43  ;;  %v463_v3 = vsub.f32 %v2673_v32, %v462_v53 }
  0x31   :  { %368 = vmatpush.msra.mxu2 %v2570_v54  ;;  %320 = vmatmul.f32.vlgmr.msrb.gmra.mxu0 %v2516_v25  ;;  %v2691_v45 = vand.u32 4294901760, %v116_v5 }
  0x32   :  { %417 = vmatpush.msra.mxu3 %v416_v16  ;;  %254 = vmatmul.f32.gmra.mxu2 %v2507_v19  ;;  %v111_v16 = vld [vmem:[%s3676_s0 + $0x8] sm:$0xff]  ;;  %v469_v23 = vsub.f32 %v2687_v43, %v468_v9  ;;  %v464_v34 = vand.u32 4294901760, %v463_v3 }
  0x33   :  { %370 = vmatpush.msra.mxu2 %v2584_v59  ;;  %347 = vmatpush.msrb.mxu1 %v2486_v8  ;;  %v114_v8 = vld [vmem:[%s3679_s3] sm:$0xff]  ;;  %v2736_v19 = vsub.f32 %v116_v5, %v2691_v45 }
  0x34   :  { %423 = vmatpush.msra.mxu3 %v422_v22  ;;  %516 = vmatpush.msra.mxu0 %v2555_v46  ;;  %v2725_v15 = vand.u32 4294901760, %v114_v8  ;;  %v474_v22 = vand.u32 4294901760, %v2705_v57 }
  0x35   :  { %372 = vmatpush.msra.mxu2 %v2598_v0  ;;  %571 = vmatpush.msra.mxu1 %v2514_v24 }
  0x36   :  { %429 = vmatpush.msra.mxu3 %v428_v33  ;;  %519 = vmatpush.msra.mxu0 %v2564_v52  ;;  %v2749_v33 = vand.u32 4294901760, %v111_v16  ;;  %v475_v5 = vsub.f32 %v2705_v57, %v474_v22  ;;  %v2759_v41 = vsub.f32 %v114_v8, %v2725_v15 }
  0x37   :  { %374 = vmatpush.msra.mxu2 %v2611_v7  ;;  %287 = vmatmul.f32.gmra.mxu3 %v171_v27  ;;  %v391_v27 = vand.u32 4294901760, %v2713_v61 }
  0x38   :  { %435 = vmatpush.msra.mxu3 %v434_v40  ;;  %349 = vmatmul.f32.vlgmr.msrb.gmra.mxu1 %v2516_v25  ;;  %v458_v25 = vand.u32 4294901760, %v457_v58  ;;  %v486_v40 = vand.u32 4294901760, %v2736_v19  ;;  %v492_v58 = vand.u32 4294901760, %v2747_v30  ;;  %v2772_v8 = vsub.f32 %v111_v16, %v2749_v33 }
  0x39   :  { %376 = vmatpush.msra.mxu2 %v2624_v14  ;;  %573 = vmatpush.msra.mxu1 %v2524_v31  ;;  %v392_v47 = vsub.f32 %v2713_v61, %v391_v27  ;;  %v498_v3 = vand.u32 4294901760, %v2759_v41 }
  0x3a   :  { %441 = vmatpush.msra.mxu3 %v440_v48  ;;  %522 = vmatpush.msra.mxu0 %v2574_v56  ;;  %v470_v48 = vand.u32 4294901760, %v469_v23  ;;  %v493_v23 = vsub.f32 %v2747_v30, %v492_v58 }
  0x3b   :  { %378 = vmatpush.msra.mxu2 %v2650_v26  ;;  %575 = vmatpush.msra.mxu1 %v2543_v39  ;;  %v393_v16 = vand.u32 4294901760, %v392_v47 }
  0x3c   :  { %447 = vmatpush.msra.mxu3 %v446_v63  ;;  %525 = vmatpush.msra.mxu0 %v2591_v62  ;;  %v476_v63 = vand.u32 4294901760, %v475_v5  ;;  %v499_v5 = vsub.f32 %v2759_v41, %v498_v3  ;;  %v494_v47 = vand.u32 4294901760, %v493_v23 }
  0x3d   :  { %380 = vmatpush.msra.mxu2 %v2659_v4  ;;  %577 = vmatpush.msra.mxu1 %v2549_v44 }
  0x3e   :  { %453 = vmatpush.msra.mxu3 %v452_v17  ;;  %324 = vmatmul.f32.gmra.mxu0 %v2492_v12  ;;  %v487_v17 = vsub.f32 %v2736_v19, %v486_v40 }
  0x3f   :  { %382 = vmatpush.msra.mxu2 %v2684_v42  ;;  %528 = vmatpush.msra.mxu0 %v2607_v6 }
  0x40   :  { %459 = vmatpush.msra.mxu3 %v458_v25  ;;  %579 = vmatpush.msra.mxu1 %v2560_v49  ;;  %v482_v25 = vand.u32 4294901760, %v481_v51  ;;  %v500_v51 = vand.u32 4294901760, %v499_v5 }
  0x41   :  { %384 = vmatpush.msra.mxu2 %v2691_v45  ;;  %353 = vmatmul.f32.gmra.mxu1 %v2492_v12  ;;  %v488_v12 = vand.u32 4294901760, %v487_v17 }
  0x42   :  { %465 = vmatpush.msra.mxu3 %v464_v34  ;;  %531 = vmatpush.msra.mxu0 %v2620_v13  ;;  %v399_v34 = vand.u32 4294901760, %v2772_v8 }
  0x43   :  { %386 = vmatpush.msra.mxu2 %v2716_v2  ;;  %581 = vmatpush.msra.mxu1 %v2570_v54 }
  0x44   :  { %471 = vmatpush.msra.mxu3 %v470_v48  ;;  %534 = vmatpush.msra.mxu0 %v2639_v20  ;;  %v400_v48 = vsub.f32 %v2772_v8, %v399_v34 }
  0x45   :  { %388 = vmatpush.msra.mxu2 %v2725_v15  ;;  %583 = vmatpush.msra.mxu1 %v2584_v59 }
  0x46   :  { %477 = vmatpush.msra.mxu3 %v476_v63  ;;  %394 = vmatmul.f32.vlgmr.msra.gmra.mxu2 %v393_v16  ;;  %v401_v38 = vand.u32 4294901760, %v400_v48 }
  0x47   :  { %618 = vmatpush.msrb.mxu2 %v408_v50  ;;  %537 = vmatpush.msra.mxu0 %v2644_v21 }
  0x48   :  { %483 = vmatpush.msra.mxu3 %v482_v25  ;;  %585 = vmatpush.msra.mxu1 %v2598_v0 }
  0x49   :  { %622 = vmatpush.msrb.mxu2 %v414_v55  ;;  %540 = vmatpush.msra.mxu0 %v2673_v32  ;;  %v765_v55 = vld [vmem:[#allocation7 + $0x60] sm:$0xff] }
  0x4a   :  { %489 = vmatpush.msra.mxu3 %v488_v12  ;;  %587 = vmatpush.msra.mxu1 %v2611_v7  ;;  %v2898_v62 = vand.u32 4294901760, %v765_v55 }
  0x4b   :  { %626 = vmatpush.msrb.mxu2 %v420_v60  ;;  %543 = vmatpush.msra.mxu0 %v2687_v43 }
  0x4c   :  { %495 = vmatpush.msra.mxu3 %v494_v47  ;;  %589 = vmatpush.msra.mxu1 %v2624_v14  ;;  %v2909_v13 = vsub.f32 %v765_v55, %v2898_v62  ;;  %v757_v47 = vld [vmem:[#allocation7 + $0x20] sm:$0xff] }
  0x4d   :  { %630 = vmatpush.msrb.mxu2 %v426_v1  ;;  %546 = vmatpush.msra.mxu0 %v2705_v57 }
  0x4e   :  { %501 = vmatpush.msra.mxu3 %v500_v51  ;;  %591 = vmatpush.msra.mxu1 %v2650_v26 }
  0x4f   :  { %402 = vmatmul.f32.gmra.mxu2 %v401_v38  ;;  %503 = vmatmul.f32.vlgmr.msra.gmra.mxu3 %v2678_v37  ;;  %v2990_v38 = vand.u32 4294901760, %v757_v47 }
  0x50   :  { %634 = vmatpush.msrb.mxu2 %v432_v11  ;;  %689 = vmatpush.msrb.mxu3 %v2514_v24  ;;  %v768_v24 = vld [vmem:[#allocation7 + $0x78] sm:$0xff] }
  0x51   :  { %549 = vmatpush.msra.mxu0 %v2720_v10  ;;  %593 = vmatpush.msra.mxu1 %v2659_v4 }
  0x52   :  { %638 = vmatpush.msrb.mxu2 %v438_v18  ;;  %691 = vmatpush.msrb.mxu3 %v2524_v31  ;;  %v2871_v31 = vand.u32 4294901760, %v768_v24  ;;  %v763_v18 = vld [vmem:[#allocation7 + $0x50] sm:$0xff] }
  0x53   :  { %552 = vmatpush.msra.mxu0 %v2736_v19  ;;  %595 = vmatpush.msra.mxu1 %v2684_v42 }
  0x54   :  { %642 = vmatpush.msrb.mxu2 %v444_v28  ;;  %693 = vmatpush.msrb.mxu3 %v2543_v39  ;;  %v767_v39 = vld [vmem:[#allocation7 + $0x70] sm:$0xff]  ;;  %v842_v28 = vand.u32 4294901760, %v2909_v13 }
  0x55   :  { %555 = vmatpush.msra.mxu0 %v2747_v30  ;;  %597 = vmatpush.msra.mxu1 %v2691_v45  ;;  %v2876_v46 = vand.u32 4294901760, %v767_v39 }
  0x56   :  { %646 = vmatpush.msrb.mxu2 %v450_v35  ;;  %695 = vmatpush.msrb.mxu3 %v2549_v44  ;;  %v2874_v44 = vsub.f32 %v768_v24, %v2871_v31  ;;  %v762_v35 = vld [vmem:[#allocation7 + $0x48] sm:$0xff] }
  0x57   :  { %558 = vmatpush.msra.mxu0 %v2759_v41  ;;  %599 = vmatpush.msra.mxu1 %v2716_v2  ;;  %v2882_v52 = vsub.f32 %v767_v39, %v2876_v46 }
  0x58   :  { %507 = vmatmul.f32.gmra.mxu3 %v2749_v33  ;;  %561 = vmatmul.f32.vlgmr.msra.gmra.mxu0 %v2713_v61  ;;  %v824_v50 = vand.u32 4294901760, %v2874_v44 }
  0x59   :  { %650 = vmatpush.msrb.mxu2 %v456_v36  ;;  %697 = vmatpush.msrb.mxu3 %v2560_v49  ;;  %v766_v49 = vld [vmem:[#allocation7 + $0x68] sm:$0xff] }
  0x5a   :  { %601 = vmatpush.msra.mxu1 %v2725_v15  ;;  %774 = vmatpush.msrb.mxu0 %v2871_v31  ;;  %v825_v56 = vsub.f32 %v2874_v44, %v824_v50 }
  0x5b   :  { %605 = vmatmul.f32.vlgmr.msra.gmra.mxu1 %v391_v27  ;;  %654 = vmatpush.msrb.mxu2 %v462_v53 }
  0x5c   :  { %699 = vmatpush.msrb.mxu3 %v2570_v54  ;;  %v2884_v54 = vand.u32 4294901760, %v766_v49  ;;  %776 = vmatpush.msrb.mxu0 %v2876_v46  ;;  %v826_v6 = vand.u32 4294901760, %v825_v56 }
  0x5d   :  { %658 = vmatpush.msrb.mxu2 %v468_v9 }
  0x5e   :  { %701 = vmatpush.msrb.mxu3 %v2584_v59  ;;  %v830_v59 = vand.u32 4294901760, %v2882_v52  ;;  %v2894_v60 = vsub.f32 %v766_v49, %v2884_v54  ;;  %778 = vmatpush.msrb.mxu0 %v2884_v54  ;;  %v756_v49 = vld [vmem:[#allocation7 + $0x18] sm:$0xff] }
  0x5f   :  { %662 = vmatpush.msrb.mxu2 %v474_v22  ;;  %827 = vmatpush.msrb.mxu1 %v826_v6  ;;  %v3001_v6 = vsub.f32 %v757_v47, %v2990_v38 }
  0x60   :  { %703 = vmatpush.msrb.mxu3 %v2598_v0  ;;  %566 = vmatmul.f32.gmra.mxu0 %v2772_v8  ;;  %v764_v0 = vld [vmem:[#allocation7 + $0x58] sm:$0xff]  ;;  %v836_v11 = vand.u32 4294901760, %v2894_v60 }
  0x61   :  { %666 = vmatpush.msrb.mxu2 %v480_v29  ;;  %780 = vmatpush.msrb.mxu0 %v2898_v62 }
  0x62   :  { %705 = vmatpush.msrb.mxu3 %v2611_v7  ;;  %v831_v7 = vsub.f32 %v2882_v52, %v830_v59  ;;  %v837_v21 = vsub.f32 %v2894_v60, %v836_v11 }
  0x63   :  { %611 = vmatmul.f32.gmra.mxu1 %v399_v34  ;;  %670 = vmatpush.msrb.mxu2 %v486_v40 }
  0x64   :  { %707 = vmatpush.msrb.mxu3 %v2624_v14  ;;  %v2911_v14 = vand.u32 4294901760, %v764_v0  ;;  %v832_v20 = vand.u32 4294901760, %v831_v7  ;;  %v838_v32 = vand.u32 4294901760, %v837_v21  ;;  %v3003_v7 = vand.u32 4294901760, %v756_v49 }
  0x65   :  { %674 = vmatpush.msrb.mxu2 %v492_v58 }
  0x66   :  { %709 = vmatpush.msrb.mxu3 %v2650_v26  ;;  %v2918_v26 = vand.u32 4294901760, %v763_v18  ;;  %782 = vmatpush.msrb.mxu0 %v2911_v14 }
  0x67   :  { %678 = vmatpush.msrb.mxu2 %v498_v3  ;;  %833 = vmatpush.msrb.mxu1 %v832_v20  ;;  %v758_v3 = vld [vmem:[#allocation7 + $0x28] sm:$0xff] }
  0x68   :  { %711 = vmatpush.msrb.mxu3 %v2659_v4  ;;  %680 = vmatmul.f32.vlgmr.msrb.gmra.mxu2 %v2678_v37  ;;  %v2922_v4 = vsub.f32 %v764_v0, %v2911_v14  ;;  %v2927_v36 = vsub.f32 %v763_v18, %v2918_v26  ;;  %v2978_v34 = vand.u32 4294901760, %v758_v3 }
  0x69   :  { %929 = vmatpush.msra.mxu2 %v2874_v44  ;;  %784 = vmatpush.msrb.mxu0 %v2918_v26 }
  0x6a   :  { %713 = vmatpush.msrb.mxu3 %v2684_v42  ;;  %v843_v42 = vsub.f32 %v2909_v13, %v842_v28  ;;  %v848_v43 = vand.u32 4294901760, %v2922_v4  ;;  %839 = vmatpush.msrb.mxu1 %v838_v32  ;;  %v854_v57 = vand.u32 4294901760, %v2927_v36  ;;  %v2988_v51 = vsub.f32 %v758_v3, %v2978_v34 }
  0x6b   :  { %932 = vmatpush.msra.mxu2 %v2882_v52 }
  0x6c   :  { %715 = vmatpush.msrb.mxu3 %v2691_v45  ;;  %v761_v45 = vld [vmem:[#allocation7 + $0x40] sm:$0xff]  ;;  %v844_v9 = vand.u32 4294901760, %v843_v42  ;;  %v849_v10 = vsub.f32 %v2922_v4, %v848_v43  ;;  %v855_v22 = vsub.f32 %v2927_v36, %v854_v57  ;;  %v884_v0 = vand.u32 4294901760, %v2988_v51 }
  0x6d   :  { %935 = vmatpush.msra.mxu2 %v2894_v60  ;;  %v890_v42 = vand.u32 4294901760, %v3001_v6 }
  0x6e   :  { %717 = vmatpush.msrb.mxu3 %v2716_v2  ;;  %v2944_v2 = vand.u32 4294901760, %v761_v45  ;;  %845 = vmatpush.msrb.mxu1 %v844_v9  ;;  %v850_v30 = vand.u32 4294901760, %v849_v10  ;;  %v856_v41 = vand.u32 4294901760, %v855_v22  ;;  %v885_v32 = vsub.f32 %v2988_v51, %v884_v0 }
  0x6f   :  { %938 = vmatpush.msra.mxu2 %v2909_v13 }
  0x70   :  { %719 = vmatpush.msrb.mxu3 %v2725_v15  ;;  %684 = vmatmul.f32.gmra.mxu2 %v2749_v33  ;;  %v760_v15 = vld [vmem:[#allocation7 + $0x38] sm:$0xff]  ;;  %v2957_v27 = vsub.f32 %v761_v45, %v2944_v2  ;;  %v3016_v45 = vsub.f32 %v756_v49, %v3003_v7 }
  0x71   :  { %721 = vmatmul.f32.vlgmr.msrb.gmra.mxu3 %v2678_v37  ;;  %v2929_v37 = vand.u32 4294901760, %v762_v35  ;;  %941 = vmatpush.msra.mxu2 %v2922_v4  ;;  %v2959_v29 = vand.u32 4294901760, %v760_v15 }
  0x72   :  { %987 = vmatpush.msra.mxu3 %v2871_v31  ;;  %v866_v8 = vand.u32 4294901760, %v2957_v27  ;;  %851 = vmatpush.msrb.mxu1 %v850_v30  ;;  %v886_v30 = vand.u32 4294901760, %v885_v32 }
  0x73   :  { %v2942_v61 = vsub.f32 %v762_v35, %v2929_v37  ;;  %786 = vmatpush.msrb.mxu0 %v2929_v37  ;;  %944 = vmatpush.msra.mxu2 %v2927_v36  ;;  %v2970_v63 = vsub.f32 %v760_v15, %v2959_v29  ;;  %v755_v35 = vld [vmem:[#allocation7 + $0x10] sm:$0xff]  ;;  %v754_v15 = vld [vmem:[#allocation7 + $0x8] sm:$0xff] }
  0x74   :  { %989 = vmatpush.msra.mxu3 %v2876_v46  ;;  %v867_v23 = vsub.f32 %v2957_v27, %v866_v8  ;;  %857 = vmatpush.msrb.mxu1 %v856_v41  ;;  %v3018_v9 = vand.u32 4294901760, %v755_v35  ;;  %v896_v41 = vand.u32 4294901760, %v3016_v45 }
  0x75   :  { %v860_v19 = vand.u32 4294901760, %v2942_v61  ;;  %788 = vmatpush.msrb.mxu0 %v2944_v2  ;;  %947 = vmatpush.msra.mxu2 %v2942_v61  ;;  %v872_v12 = vand.u32 4294901760, %v2970_v63 }
  0x76   :  { %991 = vmatpush.msra.mxu3 %v2884_v54  ;;  %v868_v48 = vand.u32 4294901760, %v867_v23 }
  0x77   :  { %v861_v58 = vsub.f32 %v2942_v61, %v860_v19  ;;  %790 = vmatpush.msrb.mxu0 %v2959_v29  ;;  %950 = vmatpush.msra.mxu2 %v2957_v27  ;;  %v873_v24 = vsub.f32 %v2970_v63, %v872_v12 }
  0x78   :  { %993 = vmatpush.msra.mxu3 %v2898_v62 }
  0x79   :  { %725 = vmatmul.f32.gmra.mxu3 %v2749_v33  ;;  %v759_v33 = vld [vmem:[#allocation7 + $0x30] sm:$0xff]  ;;  %v862_v25 = vand.u32 4294901760, %v861_v58  ;;  %953 = vmatpush.msra.mxu2 %v2970_v63  ;;  %v874_v20 = vand.u32 4294901760, %v873_v24  ;;  %v3028_v58 = vsub.f32 %v755_v35, %v3018_v9 }
  0x7a   :  { %995 = vmatpush.msra.mxu3 %v2911_v14  ;;  %v2972_v17 = vand.u32 4294901760, %v759_v33 }
  0x7b   :  { %863 = vmatpush.msrb.mxu1 %v862_v25  ;;  %v753_v25 = vld [vmem:[#allocation7] sm:$0xff]  ;;  %v902_v24 = vand.u32 4294901760, %v3028_v58 }
  0x7c   :  { %997 = vmatpush.msra.mxu3 %v2918_v26  ;;  %v2984_v5 = vsub.f32 %v759_v33, %v2972_v17  ;;  %792 = vmatpush.msrb.mxu0 %v2972_v17  ;;  %v891_v33 = vsub.f32 %v3001_v6, %v890_v42  ;;  %v3044_v49 = vand.u32 4294901760, %v753_v25 }
  0x7d   :  { %869 = vmatpush.msrb.mxu1 %v868_v48  ;;  %v897_v48 = vsub.f32 %v3016_v45, %v896_v41 }
  0x7e   :  { %999 = vmatpush.msra.mxu3 %v2929_v37  ;;  %v878_v39 = vand.u32 4294901760, %v2984_v5  ;;  %794 = vmatpush.msrb.mxu0 %v2978_v34  ;;  %v892_v47 = vand.u32 4294901760, %v891_v33  ;;  %v3054_v35 = vsub.f32 %v753_v25, %v3044_v49 }
  0x7f   :  { %956 = vmatpush.msra.mxu2 %v2984_v5  ;;  %875 = vmatpush.msrb.mxu1 %v874_v20 }
  0x80   :  { %1001 = vmatpush.msra.mxu3 %v2944_v2  ;;  %v879_v21 = vsub.f32 %v2984_v5, %v878_v39  ;;  %796 = vmatpush.msrb.mxu0 %v2990_v38 }
  0x81   :  { %959 = vmatpush.msra.mxu2 %v2988_v51 }
  0x82   :  { %1003 = vmatpush.msra.mxu3 %v2959_v29  ;;  %v880_v10 = vand.u32 4294901760, %v879_v21  ;;  %798 = vmatpush.msrb.mxu0 %v3003_v7 }
  0x83   :  { %962 = vmatpush.msra.mxu2 %v3001_v6 }
  0x84   :  { %1005 = vmatpush.msra.mxu3 %v2972_v17  ;;  %881 = vmatpush.msrb.mxu1 %v880_v10 }
  0x85   :  { %800 = vmatpush.msrb.mxu0 %v3018_v9  ;;  %965 = vmatpush.msra.mxu2 %v3016_v45 }
  0x86   :  { %1007 = vmatpush.msra.mxu3 %v2978_v34  ;;  %887 = vmatpush.msrb.mxu1 %v886_v30  ;;  %v914_v30 = vand.u32 4294901760, %v3054_v35 }
  0x87   :  { %968 = vmatpush.msra.mxu2 %v3028_v58 }
  0x88   :  { %1009 = vmatpush.msra.mxu3 %v2990_v38  ;;  %893 = vmatpush.msrb.mxu1 %v892_v47 }
  0x8a   :  { %1011 = vmatpush.msra.mxu3 %v3003_v7 }
  0x8c   :  { %1013 = vmatpush.msra.mxu3 %v3018_v9 }
  0xa3   :  { %v167_v16 = vpop.f32.mrf.mxu0 }
  0xa5   :  { %v2901_v1 = vpop.f32.mrf.mxu2 }
  0xa8   :  { %v216_v55 = vpop.f32.mrf.mxu1 }
  0xa9   :  { %v217_v18 = vadd.f32 %v216_v55, %v167_v16  ;;  %v3032_v16 = vand.u32 4294901760, %v754_v15  ;;  %v898_v55 = vand.u32 4294901760, %v897_v48 }
  0xaa   :  { %v2938_v53 = vpop.f32.mrf.mxu3 }
  0xab   :  { %802 = vmatpush.msrb.mxu0 %v3032_v16  ;;  %1015 = vmatpush.msra.mxu3 %v3032_v16  ;;  %v221_v52 = vadd.f32 %v2938_v53, %v2901_v1 }
  0xac   :  { %899 = vmatpush.msrb.mxu1 %v898_v55 }
  0xad   :  { %v250_v40 = vpop.f32.mrf.mxu2  ;;  %804 = vmatpush.msrb.mxu0 %v3044_v49  ;;  %1017 = vmatpush.msra.mxu3 %v3044_v49 }
  0xae   :  { %v251_v3 = vadd.f32 %v250_v40, %v217_v18  ;;  %v321_v23 = vpop.f32.mrf.mxu0  ;;  %v3042_v40 = vsub.f32 %v754_v15, %v3032_v16  ;;  %v903_v18 = vsub.f32 %v3028_v58, %v902_v24 }
  0xaf   :  { %1034 = vmatpush.msra.mxu0 %v824_v50  ;;  %v915_v50 = vsub.f32 %v3054_v35, %v914_v30 }
  0xb0   :  { %v908_v21 = vand.u32 4294901760, %v3042_v40  ;;  %v904_v15 = vand.u32 4294901760, %v903_v18  ;;  %971 = vmatpush.msra.mxu2 %v3042_v40 }
  0xb1   :  { %1038 = vmatpush.msra.mxu0 %v830_v59  ;;  %v916_v25 = vand.u32 4294901760, %v915_v50  ;;  %v1178_v50 = vld [vmem:[#allocation8 + $0x78] sm:$0xff] }
  0xb2   :  { %v282_v56 = vpop.f32.mrf.mxu3  ;;  %974 = vmatpush.msra.mxu2 %v3054_v35  ;;  %905 = vmatpush.msrb.mxu1 %v904_v15 }
  0xb3   :  { %v283_v20 = vadd.f32 %v282_v56, %v251_v3  ;;  %v909_v56 = vsub.f32 %v3042_v40, %v908_v21  ;;  %1042 = vmatpush.msra.mxu0 %v836_v11 }
  0xb5   :  { %v255_v22 = vpop.f32.mrf.mxu2  ;;  %v350_v32 = vpop.f32.mrf.mxu1  ;;  %v322_v3 = vadd.f32 %v321_v23, %v283_v20  ;;  %v910_v44 = vand.u32 4294901760, %v909_v56  ;;  %1046 = vmatpush.msra.mxu0 %v842_v28 }
  0xb6   :  { %v256_v48 = vadd.f32 %v255_v22, %v221_v52  ;;  %v1177_v52 = vld [vmem:[#allocation8 + $0x70] sm:$0xff] }
  0xb7   :  { %911 = vmatpush.msrb.mxu1 %v910_v44  ;;  %v351_v59 = vadd.f32 %v350_v32, %v322_v3  ;;  %1050 = vmatpush.msra.mxu0 %v848_v43 }
  0xb9   :  { %917 = vmatpush.msrb.mxu1 %v916_v25  ;;  %1054 = vmatpush.msra.mxu0 %v854_v57  ;;  %v3120_v25 = vand.u32 4294901760, %v1178_v50 }
  0xba   :  { %v288_v10 = vpop.f32.mrf.mxu3 }
  0xbb   :  { %v325_v47 = vpop.f32.mrf.mxu0  ;;  %1105 = vmatpush.msra.mxu1 %v2871_v31  ;;  %v289_v11 = vadd.f32 %v288_v10, %v256_v48  ;;  %1058 = vmatpush.msra.mxu0 %v860_v19  ;;  %v1176_v48 = vld [vmem:[#allocation8 + $0x68] sm:$0xff] }
  0xbc   :  { %1184 = vmatpush.msrb.mxu2 %v3120_v25 }
  0xbd   :  { %1107 = vmatpush.msra.mxu1 %v2876_v46  ;;  %1062 = vmatpush.msra.mxu0 %v866_v8  ;;  %v326_v31 = vadd.f32 %v325_v47, %v289_v11  ;;  %v3123_v47 = vsub.f32 %v1178_v50, %v3120_v25  ;;  %v3134_v11 = vand.u32 4294901760, %v1176_v48 }
  0xbe   :  { %v354_v60 = vpop.f32.mrf.mxu1 }
  0xbf   :  { %1109 = vmatpush.msra.mxu1 %v2884_v54  ;;  %1066 = vmatpush.msra.mxu0 %v872_v12  ;;  %v355_v54 = vadd.f32 %v354_v60, %v326_v31  ;;  %v3143_v31 = vsub.f32 %v1176_v48, %v3134_v11 }
  0xc1   :  { %1111 = vmatpush.msra.mxu1 %v2898_v62  ;;  %1070 = vmatpush.msra.mxu0 %v878_v39 }
  0xc3   :  { %1113 = vmatpush.msra.mxu1 %v2911_v14  ;;  %1074 = vmatpush.msra.mxu0 %v884_v0 }
  0xc5   :  { %1115 = vmatpush.msra.mxu1 %v2918_v26  ;;  %1078 = vmatpush.msra.mxu0 %v890_v42 }
  0xc7   :  { %1117 = vmatpush.msra.mxu1 %v2929_v37  ;;  %1082 = vmatpush.msra.mxu0 %v896_v41  ;;  %v2164_v37 = vld [vmem:[%s3681_s5] ss:$0 sm:$0xff] }
  0xc9   :  { %v395_v33 = vpop.f32.mrf.mxu2  ;;  %1119 = vmatpush.msra.mxu1 %v2944_v2  ;;  %1086 = vmatpush.msra.mxu0 %v902_v24 }
  0xca   :  { %v396_v13 = vadd.f32 %v395_v33, %v351_v59  ;;  %v3127_v59 = vand.u32 4294901760, %v1177_v52 }
  0xcb   :  { %1121 = vmatpush.msra.mxu1 %v2959_v29  ;;  %1090 = vmatpush.msra.mxu0 %v908_v21 }
  0xcc   :  { %v3132_v60 = vsub.f32 %v1177_v52, %v3127_v59  ;;  %1186 = vmatpush.msrb.mxu2 %v3127_v59 }
  0xcd   :  { %1123 = vmatpush.msra.mxu1 %v2972_v17  ;;  %1094 = vmatpush.msra.mxu0 %v914_v30 }
  0xce   :  { %1188 = vmatpush.msrb.mxu2 %v3134_v11 }
  0xcf   :  { %1125 = vmatpush.msra.mxu1 %v2978_v34 }
  0xd1   :  { %1127 = vmatpush.msra.mxu1 %v2990_v38 }
  0xd2   :  { %v504_v23 = vpop.f32.mrf.mxu3  ;;  %v403_v28 = vpop.f32.mrf.mxu2 }
  0xd3   :  { %v505_v4 = vadd.f32 %v504_v23, %v396_v13  ;;  %v404_v53 = vadd.f32 %v403_v28, %v355_v54  ;;  %1129 = vmatpush.msra.mxu1 %v3003_v7  ;;  %v1234_v23 = vand.u32 4294901760, %v3123_v47  ;;  %v1175_v28 = vld [vmem:[#allocation8 + $0x60] sm:$0xff] }
  0xd5   :  { %v562_v1 = vpop.f32.mrf.mxu0  ;;  %1131 = vmatpush.msra.mxu1 %v3018_v9  ;;  %v1235_v13 = vsub.f32 %v3123_v47, %v1234_v23 }
  0xd6   :  { %v563_v43 = vadd.f32 %v562_v1, %v505_v4  ;;  %v1240_v1 = vand.u32 4294901760, %v3132_v60  ;;  %v3145_v4 = vand.u32 4294901760, %v1175_v28 }
  0xd7   :  { %1133 = vmatpush.msra.mxu1 %v3032_v16 }
  0xd8   :  { %v606_v46 = vpop.f32.mrf.mxu1  ;;  %v1241_v54 = vsub.f32 %v3132_v60, %v1240_v1  ;;  %1190 = vmatpush.msrb.mxu2 %v3145_v4 }
  0xd9   :  { %v607_v14 = vadd.f32 %v606_v46, %v563_v43  ;;  %1135 = vmatpush.msra.mxu1 %v3044_v49  ;;  %v1236_v46 = vand.u32 4294901760, %v1235_v13  ;;  %v1246_v43 = vand.u32 4294901760, %v3143_v31 }
  0xdb   :  { %v508_v36 = vpop.f32.mrf.mxu3  ;;  %1237 = vmatpush.msrb.mxu3 %v1236_v46 }
  0xdc   :  { %v509_v57 = vadd.f32 %v508_v36, %v404_v53  ;;  %v1174_v36 = vld [vmem:[#allocation8 + $0x58] sm:$0xff] }
  0xdd   :  { %v567_v26 = vpop.f32.mrf.mxu0  ;;  %v3157_v53 = vand.u32 4294901760, %v1174_v36 }
  0xde   :  { %v568_v2 = vadd.f32 %v567_v26, %v509_v57  ;;  %v1242_v57 = vand.u32 4294901760, %v1241_v54  ;;  %v1247_v26 = vsub.f32 %v3143_v31, %v1246_v43 }
  0xdf   :  { %1192 = vmatpush.msrb.mxu2 %v3157_v53 }
  0xe0   :  { %v612_v8 = vpop.f32.mrf.mxu1  ;;  %1243 = vmatpush.msrb.mxu3 %v1242_v57 }
  0xe1   :  { %v613_v12 = vadd.f32 %v612_v8, %v568_v2  ;;  %v1172_v2 = vld [vmem:[#allocation8 + $0x48] sm:$0xff] }
  0xeb   :  { %v681_v62 = vpop.f32.mrf.mxu2 }
  0xec   :  { %v682_v61 = vadd.f32 %v681_v62, %v607_v14  ;;  %v3155_v62 = vsub.f32 %v1175_v28, %v3145_v4  ;;  %v1173_v14 = vld [vmem:[#allocation8 + $0x50] sm:$0xff] }
  0xed   :  { %v1165_v28 = vld [vmem:[#allocation8 + $0x10] sm:$0xff] }
  0xf3   :  { %v685_v63 = vpop.f32.mrf.mxu2 }
  0xf4   :  { %v722_v19 = vpop.f32.mrf.mxu3  ;;  %v686_v5 = vadd.f32 %v685_v63, %v613_v12  ;;  %v3178_v63 = vand.u32 4294901760, %v1172_v2 }
  0xf5   :  { %v723_v27 = vadd.f32 %v722_v19, %v682_v61  ;;  %v1252_v61 = vand.u32 4294901760, %v3155_v62  ;;  %v3171_v19 = vand.u32 4294901760, %v1173_v14 }
  0xf7   :  { %v733_v29 = vadd.f32 %v2164_v37, %v723_v27  ;;  %v1248_v27 = vand.u32 4294901760, %v1247_v26  ;;  %v1253_v8 = vsub.f32 %v3155_v62, %v1252_v61  ;;  %v3182_v12 = vsub.f32 %v1173_v14, %v3171_v19  ;;  %1194 = vmatpush.msrb.mxu2 %v3171_v19  ;;  %v1164_v26 = vld [vmem:[#allocation8 + $0x8] sm:$0xff] }
  0xf8   :  { %v3260_v14 = vand.u32 4294901760, %v1165_v28 }
  0xf9   :  { %v737_v17 = vmul.f32 0.044715, %v733_v29  ;;  %v735_v40 = vmul.f32 0.5, %v733_v29  ;;  %1249 = vmatpush.msrb.mxu3 %v1248_v27  ;;  %1196 = vmatpush.msrb.mxu2 %v3178_v63 }
  0xfb   :  { %v739_v51 = vmul.f32 %v737_v17, %v733_v29  ;;  %v1171_v17 = vld [vmem:[#allocation8 + $0x40] sm:$0xff] }
  0xfc   :  { %v726_v39 = vpop.f32.mrf.mxu3 }
  0xfd   :  { %v741_v34 = vmul.f32 %v739_v51, %v733_v29  ;;  %v727_v0 = vadd.f32 %v726_v39, %v686_v5  ;;  %v1254_v5 = vand.u32 4294901760, %v1253_v8  ;;  %v3190_v39 = vsub.f32 %v1172_v2, %v3178_v63 }
  0xfe   :  { %v3273_v8 = vsub.f32 %v1165_v28, %v3260_v14 }
  0xff   :  { %v734_v6 = vadd.f32 %v2164_v37, %v727_v0  ;;  %v743_v42 = vadd.f32 %v741_v34, %v733_v29  ;;  %v3167_v37 = vsub.f32 %v1174_v36, %v3157_v53  ;;  %v3192_v34 = vand.u32 4294901760, %v1171_v17  ;;  %1255 = vmatpush.msrb.mxu3 %v1254_v5 }
 0x100   :  { %v1264_v0 = vand.u32 4294901760, %v3182_v12 }
 0x101   :  { %v738_v38 = vmul.f32 0.044715, %v734_v6  ;;  %v745_v45 = vmul.f32 0.7978846, %v743_v42  ;;  %v736_v35 = vmul.f32 0.5, %v734_v6  ;;  %v1258_v29 = vand.u32 4294901760, %v3167_v37  ;;  %1198 = vmatpush.msrb.mxu2 %v3192_v34 }
 0x103   :  { %v740_v22 = vmul.f32 %v738_v38, %v734_v6  ;;  %2168 = vtanh.f32 %v745_v45  ;;  %v1259_v51 = vsub.f32 %v3167_v37, %v1258_v29  ;;  %v1270_v38 = vand.u32 4294901760, %v3190_v39 }
 0x104   :  { %v3199_v45 = vsub.f32 %v1171_v17, %v3192_v34  ;;  %v3275_v17 = vand.u32 4294901760, %v1164_v26 }
 0x105   :  { %v742_v41 = vmul.f32 %v740_v22, %v734_v6  ;;  %v1260_v42 = vand.u32 4294901760, %v1259_v51  ;;  %v1163_v51 = vld [vmem:[#allocation8] sm:$0xff] }
 0x107   :  { %v744_v58 = vadd.f32 %v742_v41, %v734_v6  ;;  %v1170_v6 = vld [vmem:[#allocation8 + $0x38] sm:$0xff]  ;;  %v1265_v41 = vsub.f32 %v3182_v12, %v1264_v0  ;;  %1261 = vmatpush.msrb.mxu3 %v1260_v42 }
 0x108   :  { %v3201_v22 = vand.u32 4294901760, %v1170_v6 }
 0x109   :  { %v2169_v7 = vpop.eup %2168  ;;  %v746_v24 = vmul.f32 0.7978846, %v744_v58  ;;  %v1169_v58 = vld [vmem:[#allocation8 + $0x30] sm:$0xff] }
 0x10a   :  { %v749_v55 = vadd.f32 1.0, %v2169_v7  ;;  %v1271_v7 = vsub.f32 %v3190_v39, %v1270_v38  ;;  %1200 = vmatpush.msrb.mxu2 %v3201_v22 }
 0x10b   :  { %2170 = vtanh.f32 %v746_v24  ;;  %v1276_v24 = vand.u32 4294901760, %v3199_v45 }
 0x10c   :  { %v751_v9 = vmul.f32 %v749_v55, %v735_v40  ;;  %v3214_v40 = vsub.f32 %v1170_v6, %v3201_v22  ;;  %v3216_v55 = vand.u32 4294901760, %v1169_v58 }
 0x10e   :  { %v805_v18 = vand.u32 4294901760, %v751_v9  ;;  %1202 = vmatpush.msrb.mxu2 %v3216_v55 }
 0x110   :  { %919 = vmatmul.f32.vlgmr.msrb.gmra.mxu1 %v805_v18  ;;  %v806_v20 = vsub.f32 %v751_v9, %v805_v18  ;;  %v1266_v9 = vand.u32 4294901760, %v1265_v41  ;;  %v1312_v41 = vand.u32 4294901760, %v3273_v8 }
 0x111   :  { %v2171_v16 = vpop.eup %2170  ;;  %1397 = vmatpush.msrb.mxu1 %v3120_v25 }
 0x112   :  { %977 = vmatmul.f32.vlgmr.msra.gmra.mxu2 %v806_v20  ;;  %v807_v21 = vand.u32 4294901760, %v806_v20  ;;  %v750_v49 = vadd.f32 1.0, %v2171_v16  ;;  %v1277_v16 = vsub.f32 %v3199_v45, %v1276_v24  ;;  %1267 = vmatpush.msrb.mxu3 %v1266_v9 }
 0x113   :  { %1399 = vmatpush.msrb.mxu1 %v3127_v59 }
 0x114   :  { %1021 = vmatmul.f32.vlgmr.msra.gmra.mxu3 %v807_v21  ;;  %v808_v32 = vsub.f32 %v806_v20, %v807_v21  ;;  %v752_v10 = vmul.f32 %v750_v49, %v736_v35  ;;  %v1272_v20 = vand.u32 4294901760, %v1271_v7  ;;  %v1282_v21 = vand.u32 4294901760, %v3214_v40 }
 0x115   :  { %1401 = vmatpush.msrb.mxu1 %v3134_v11  ;;  %v3226_v35 = vsub.f32 %v1169_v58, %v3216_v55  ;;  %v3285_v58 = vsub.f32 %v1164_v26, %v3275_v17  ;;  %v3289_v7 = vand.u32 4294901760, %v1163_v51 }
 0x116   :  { %v809_v15 = vand.u32 4294901760, %v808_v32  ;;  %v813_v56 = vand.u32 4294901760, %v752_v10  ;;  %v1167_v32 = vld [vmem:[#allocation8 + $0x20] sm:$0xff]  ;;  %1273 = vmatpush.msrb.mxu3 %v1272_v20 }
 0x117   :  { %1403 = vmatpush.msrb.mxu1 %v3145_v4  ;;  %v1318_v20 = vand.u32 4294901760, %v3285_v58 }
 0x118   :  { %810 = vmatmul.f32.vlgmr.msrb.gmra.mxu0 %v809_v15  ;;  %923 = vmatmul.f32.gmra.mxu1 %v813_v56  ;;  %v814_v30 = vsub.f32 %v752_v10, %v813_v56  ;;  %v1278_v10 = vand.u32 4294901760, %v1277_v16  ;;  %v1283_v15 = vsub.f32 %v3214_v40, %v1282_v21  ;;  %v1323_v16 = vsub.f32 %v1163_v51, %v3289_v7 }
 0x119   :  { %1339 = vmatpush.msrb.mxu0 %v3123_v47  ;;  %1405 = vmatpush.msrb.mxu1 %v3157_v53 }
 0x11a   :  { %982 = vmatmul.f32.gmra.mxu2 %v814_v30  ;;  %v815_v33 = vand.u32 4294901760, %v814_v30  ;;  %1279 = vmatpush.msrb.mxu3 %v1278_v10  ;;  %v1319_v10 = vsub.f32 %v3285_v58, %v1318_v20 }
 0x11b   :  { %1342 = vmatpush.msrb.mxu0 %v3132_v60  ;;  %1407 = vmatpush.msrb.mxu1 %v3171_v19 }
 0x11c   :  { %1027 = vmatmul.f32.gmra.mxu3 %v815_v33  ;;  %v816_v3 = vsub.f32 %v814_v30, %v815_v33  ;;  %v3236_v30 = vand.u32 4294901760, %v1167_v32 }
 0x11d   :  { %1345 = vmatpush.msrb.mxu0 %v3143_v31  ;;  %1409 = vmatpush.msrb.mxu1 %v3178_v63 }
 0x11e   :  { %v817_v44 = vand.u32 4294901760, %v816_v3  ;;  %v1166_v3 = vld [vmem:[#allocation8 + $0x18] sm:$0xff]  ;;  %v3248_v52 = vsub.f32 %v1167_v32, %v3236_v30 }
 0x11f   :  { %1348 = vmatpush.msrb.mxu0 %v3155_v62  ;;  %1411 = vmatpush.msrb.mxu1 %v3192_v34  ;;  %v3250_v48 = vand.u32 4294901760, %v1166_v3 }
 0x120   :  { %818 = vmatmul.f32.gmra.mxu0 %v817_v44  ;;  %1137 = vmatmul.f32.vlgmr.msra.gmra.mxu1 %v805_v18  ;;  %v1284_v44 = vand.u32 4294901760, %v1283_v15  ;;  %v1300_v36 = vand.u32 4294901760, %v3248_v52  ;;  %v1324_v15 = vand.u32 4294901760, %v1323_v16 }
 0x121   :  { %1351 = vmatpush.msrb.mxu0 %v3167_v37  ;;  %1413 = vmatpush.msrb.mxu1 %v3201_v22  ;;  %v3258_v54 = vsub.f32 %v1166_v3, %v3250_v48  ;;  %v1320_v3 = vand.u32 4294901760, %v1319_v10 }
 0x122   :  { %1285 = vmatpush.msrb.mxu3 %v1284_v44  ;;  %v1301_v2 = vsub.f32 %v3248_v52, %v1300_v36  ;;  %v1325_v44 = vsub.f32 %v1323_v16, %v1324_v15 }
 0x123   :  { %1354 = vmatpush.msrb.mxu0 %v3182_v12  ;;  %1415 = vmatpush.msrb.mxu1 %v3216_v55  ;;  %v1306_v27 = vand.u32 4294901760, %v3258_v54 }
 0x124   :  { %v1302_v6 = vand.u32 4294901760, %v1301_v2  ;;  %v1326_v47 = vand.u32 4294901760, %v1325_v44  ;;  %v1585_v44 = vld [vmem:[%s3686_s10 + $0x60] sm:$0xff] }
 0x125   :  { %1357 = vmatpush.msrb.mxu0 %v3190_v39  ;;  %v1307_v42 = vsub.f32 %v3258_v54, %v1306_v27 }
 0x127   :  { %1360 = vmatpush.msrb.mxu0 %v3199_v45  ;;  %v1308_v9 = vand.u32 4294901760, %v1307_v42 }
 0x128   :  { %1096 = vmatmul.f32.vlgmr.msra.gmra.mxu0 %v805_v18  ;;  %1141 = vmatmul.f32.gmra.mxu1 %v813_v56  ;;  %v1168_v18 = vld [vmem:[#allocation8 + $0x28] sm:$0xff] }
 0x129   :  { %v3229_v49 = vand.u32 4294901760, %v1168_v18  ;;  %1363 = vmatpush.msrb.mxu0 %v3214_v40 }
 0x12b   :  { %v3241_v33 = vsub.f32 %v1168_v18, %v3229_v49  ;;  %1204 = vmatpush.msrb.mxu2 %v3229_v49  ;;  %1366 = vmatpush.msrb.mxu0 %v3226_v35  ;;  %v1313_v18 = vsub.f32 %v3273_v8, %v1312_v41 }
 0x12c   :  { %1417 = vmatpush.msrb.mxu1 %v3229_v49 }
 0x12d   :  { %v1294_v13 = vand.u32 4294901760, %v3241_v33  ;;  %1206 = vmatpush.msrb.mxu2 %v3236_v30  ;;  %1369 = vmatpush.msrb.mxu0 %v3241_v33  ;;  %v1314_v32 = vand.u32 4294901760, %v1313_v18  ;;  %v1587_v18 = vld [vmem:[%s3686_s10 + $0x70] sm:$0xff] }
 0x12e   :  { %1419 = vmatpush.msrb.mxu1 %v3236_v30 }
 0x12f   :  { %v1295_v57 = vsub.f32 %v3241_v33, %v1294_v13  ;;  %1208 = vmatpush.msrb.mxu2 %v3250_v48  ;;  %1372 = vmatpush.msrb.mxu0 %v3248_v52 }
 0x130   :  { %1100 = vmatmul.f32.gmra.mxu0 %v813_v56  ;;  %v1288_v56 = vand.u32 4294901760, %v3226_v35  ;;  %1421 = vmatpush.msrb.mxu1 %v3250_v48 }
 0x131   :  { %v1296_v5 = vand.u32 4294901760, %v1295_v57  ;;  %1210 = vmatpush.msrb.mxu2 %v3260_v14  ;;  %1375 = vmatpush.msrb.mxu0 %v3258_v54 }
 0x132   :  { %v1289_v50 = vsub.f32 %v3226_v35, %v1288_v56  ;;  %1423 = vmatpush.msrb.mxu1 %v3260_v14 }
 0x133   :  { %1212 = vmatpush.msrb.mxu2 %v3275_v17  ;;  %1378 = vmatpush.msrb.mxu0 %v3273_v8 }
 0x134   :  { %v1290_v46 = vand.u32 4294901760, %v1289_v50  ;;  %1425 = vmatpush.msrb.mxu1 %v3275_v17 }
 0x135   :  { %1214 = vmatpush.msrb.mxu2 %v3289_v7  ;;  %1381 = vmatpush.msrb.mxu0 %v3285_v58 }
 0x136   :  { %1291 = vmatpush.msrb.mxu3 %v1290_v46  ;;  %1427 = vmatpush.msrb.mxu1 %v3289_v7 }
 0x137   :  { %1444 = vmatpush.msra.mxu2 %v1234_v23  ;;  %1384 = vmatpush.msrb.mxu0 %v1323_v16  ;;  %v2165_v23 = vld [vmem:[%s3683_s7] ss:$0 sm:$0xff]  ;;  %v3361_v16 = vand.u32 4294901760, %v1587_v18  ;;  %s2374_s7 = smov [#allocation13]  }
 0x138   :  { %1297 = vmatpush.msrb.mxu3 %v1296_v5  ;;  %s2114_s24 = sshll.u32 %s2374_s7, 4  ;;  %s2115_s24 = int_to_ptr.vmem [resolvable:$true] %s2114_s24 }
 0x139   :  { %1448 = vmatpush.msra.mxu2 %v1240_v1 }
 0x13a   :  { %1303 = vmatpush.msrb.mxu3 %v1302_v6 }
 0x13b   :  { %1452 = vmatpush.msra.mxu2 %v1246_v43 }
 0x13c   :  { %1309 = vmatpush.msrb.mxu3 %v1308_v9 }
 0x13d   :  { %1456 = vmatpush.msra.mxu2 %v1252_v61 }
 0x13e   :  { %1315 = vmatpush.msrb.mxu3 %v1314_v32  ;;  %v1586_v32 = vld [vmem:[%s3686_s10 + $0x68] sm:$0xff] }
 0x13f   :  { %1460 = vmatpush.msra.mxu2 %v1258_v29 }
 0x140   :  { %1321 = vmatpush.msrb.mxu3 %v1320_v3  ;;  %v3372_v3 = vand.u32 4294901760, %v1586_v32 }
 0x141   :  { %1464 = vmatpush.msra.mxu2 %v1264_v0 }
 0x142   :  { %1327 = vmatpush.msrb.mxu3 %v1326_v47 }
 0x143   :  { %1468 = vmatpush.msra.mxu2 %v1270_v38 }
 0x144   :  { %1515 = vmatpush.msra.mxu3 %v3120_v25 }
 0x145   :  { %1472 = vmatpush.msra.mxu2 %v1276_v24 }
 0x146   :  { %1517 = vmatpush.msra.mxu3 %v3127_v59 }
 0x147   :  { %1476 = vmatpush.msra.mxu2 %v1282_v21 }
 0x148   :  { %1519 = vmatpush.msra.mxu3 %v3134_v11 }
 0x149   :  { %1480 = vmatpush.msra.mxu2 %v1288_v56 }
 0x14a   :  { %1521 = vmatpush.msra.mxu3 %v3145_v4 }
 0x14b   :  { %1484 = vmatpush.msra.mxu2 %v1294_v13 }
 0x14c   :  { %1523 = vmatpush.msra.mxu3 %v3157_v53 }
 0x14d   :  { %1488 = vmatpush.msra.mxu2 %v1300_v36 }
 0x14e   :  { %1525 = vmatpush.msra.mxu3 %v3171_v19 }
 0x14f   :  { %1492 = vmatpush.msra.mxu2 %v1306_v27 }
 0x150   :  { %1527 = vmatpush.msra.mxu3 %v3178_v63 }
 0x151   :  { %1496 = vmatpush.msra.mxu2 %v1312_v41 }
 0x152   :  { %1529 = vmatpush.msra.mxu3 %v3192_v34 }
 0x153   :  { %1500 = vmatpush.msra.mxu2 %v1318_v20 }
 0x154   :  { %1531 = vmatpush.msra.mxu3 %v3201_v22 }
 0x155   :  { %1504 = vmatpush.msra.mxu2 %v1324_v15  ;;  %v3370_v15 = vsub.f32 %v1587_v18, %v3361_v16 }
 0x156   :  { %1533 = vmatpush.msra.mxu3 %v3216_v55 }
 0x157   :  { %v1650_v47 = vand.u32 4294901760, %v3370_v15 }
 0x158   :  { %1535 = vmatpush.msra.mxu3 %v3229_v49 }
 0x15a   :  { %1537 = vmatpush.msra.mxu3 %v3236_v30 }
 0x15c   :  { %1539 = vmatpush.msra.mxu3 %v3250_v48 }
 0x15e   :  { %1541 = vmatpush.msra.mxu3 %v3260_v14 }
 0x160   :  { %1543 = vmatpush.msra.mxu3 %v3275_v17 }
 0x162   :  { %1545 = vmatpush.msra.mxu3 %v3289_v7  ;;  %v1588_v7 = vld [vmem:[%s3686_s10 + $0x78] sm:$0xff] }
 0x163   :  { %v3353_v9 = vand.u32 4294901760, %v1588_v7 }
 0x165   :  { %v3359_v20 = vsub.f32 %v1588_v7, %v3353_v9  ;;  %1594 = vmatpush.msra.mxu0 %v3353_v9 }
 0x167   :  { %v1644_v10 = vand.u32 4294901760, %v3359_v20  ;;  %1596 = vmatpush.msra.mxu0 %v3361_v16 }
 0x169   :  { %1598 = vmatpush.msra.mxu0 %v3372_v3 }
 0x18d   :  { %v920_v50 = vpop.f32.mrf.mxu1 }
 0x195   :  { %v811_v60 = vpop.f32.mrf.mxu0  ;;  %v924_v25 = vpop.f32.mrf.mxu1 }
 0x196   :  { %v812_v1 = vadd.f32 %v2165_v23, %v811_v60  ;;  %v978_v59 = vpop.f32.mrf.mxu2  ;;  %v3387_v60 = vand.u32 4294901760, %v1585_v44 }
 0x197   :  { %v1022_v4 = vpop.f32.mrf.mxu3 }
 0x198   :  { %v921_v31 = vadd.f32 %v920_v50, %v812_v1  ;;  %v1645_v50 = vsub.f32 %v3359_v20, %v1644_v10  ;;  %v1584_v1 = vld [vmem:[%s3686_s10 + $0x58] sm:$0xff]  ;;  %1600 = vmatpush.msra.mxu0 %v3387_v60 }
 0x19a   :  { %v979_v11 = vadd.f32 %v978_v59, %v921_v31  ;;  %v1651_v31 = vsub.f32 %v3370_v15, %v1650_v47 }
 0x19c   :  { %v1023_v53 = vadd.f32 %v1022_v4, %v979_v11  ;;  %v3404_v11 = vand.u32 4294901760, %v1584_v1  ;;  %v1652_v4 = vand.u32 4294901760, %v1651_v31 }
 0x19d   :  { %v819_v43 = vpop.f32.mrf.mxu0  ;;  %v1138_v37 = vpop.f32.mrf.mxu1 }
 0x19e   :  { %v820_v62 = vadd.f32 %v2165_v23, %v819_v43  ;;  %v983_v63 = vpop.f32.mrf.mxu2  ;;  %v3385_v23 = vsub.f32 %v1586_v32, %v3372_v3  ;;  %v3400_v43 = vsub.f32 %v1585_v44, %v3387_v60  ;;  %1602 = vmatpush.msra.mxu0 %v3404_v11 }
 0x19f   :  { %v1028_v0 = vpop.f32.mrf.mxu3 }
 0x1a0   :  { %v925_v61 = vadd.f32 %v924_v25, %v820_v62  ;;  %v1646_v25 = vand.u32 4294901760, %v1645_v50  ;;  %v1656_v59 = vand.u32 4294901760, %v3385_v23  ;;  %v1583_v62 = vld [vmem:[%s3686_s10 + $0x50] sm:$0xff] }
 0x1a1   :  { %v1575_v50 = vld [vmem:[%s3686_s10 + $0x10] sm:$0xff] }
 0x1a2   :  { %v984_v12 = vadd.f32 %v983_v63, %v925_v61  ;;  %1647 = vmatpush.msra.mxu1 %v1646_v25  ;;  %v1662_v61 = vand.u32 4294901760, %v3400_v43 }
 0x1a4   :  { %v1029_v38 = vadd.f32 %v1028_v0, %v984_v12  ;;  %1653 = vmatpush.msra.mxu1 %v1652_v4  ;;  %v1663_v12 = vsub.f32 %v3400_v43, %v1662_v61 }
 0x1a5   :  { %v1097_v19 = vpop.f32.mrf.mxu0  ;;  %v1142_v55 = vpop.f32.mrf.mxu1 }
 0x1a6   :  { %v1098_v29 = vadd.f32 %v1097_v19, %v1023_v53  ;;  %v1657_v53 = vsub.f32 %v3385_v23, %v1656_v59  ;;  %v3418_v19 = vsub.f32 %v1584_v1, %v3404_v11 }
 0x1a8   :  { %v1139_v39 = vadd.f32 %v1138_v37, %v1098_v29  ;;  %v3414_v37 = vand.u32 4294901760, %v1583_v62  ;;  %v1582_v29 = vld [vmem:[%s3686_s10 + $0x48] sm:$0xff]  ;;  %v1658_v63 = vand.u32 4294901760, %v1657_v53  ;;  %v1668_v0 = vand.u32 4294901760, %v3418_v19 }
 0x1a9   :  { %v1574_v53 = vld [vmem:[%s3686_s10 + $0x8] sm:$0xff] }
 0x1aa   :  { %v1147_v34 = vmul.f32 0.044715, %v1139_v39  ;;  %v1145_v28 = vmul.f32 0.5, %v1139_v39  ;;  %1604 = vmatpush.msra.mxu0 %v3414_v37  ;;  %1659 = vmatpush.msra.mxu1 %v1658_v63 }
 0x1ac   :  { %v1149_v45 = vmul.f32 %v1147_v34, %v1139_v39  ;;  %v3431_v34 = vand.u32 4294901760, %v1582_v29 }
 0x1ad   :  { %v1101_v22 = vpop.f32.mrf.mxu0 }
 0x1ae   :  { %v1151_v24 = vmul.f32 %v1149_v45, %v1139_v39  ;;  %v1102_v40 = vadd.f32 %v1101_v22, %v1029_v38  ;;  %v1581_v38 = vld [vmem:[%s3686_s10 + $0x40] sm:$0xff]  ;;  %v1664_v45 = vand.u32 4294901760, %v1663_v12  ;;  %1606 = vmatpush.msra.mxu0 %v3431_v34 }
 0x1b0   :  { %v1143_v21 = vadd.f32 %v1142_v55, %v1102_v40  ;;  %v1153_v35 = vadd.f32 %v1151_v24, %v1139_v39  ;;  %v3429_v39 = vsub.f32 %v1583_v62, %v3414_v37  ;;  %v3441_v24 = vsub.f32 %v1582_v29, %v3431_v34  ;;  %1665 = vmatpush.msra.mxu1 %v1664_v45 }
 0x1b1   :  { %v3443_v40 = vand.u32 4294901760, %v1581_v38  ;;  %v1669_v55 = vsub.f32 %v3418_v19, %v1668_v0  ;;  %v3535_v62 = vand.u32 4294901760, %v1575_v50  ;;  %v3552_v45 = vand.u32 4294901760, %v1574_v53 }
 0x1b2   :  { %v1148_v49 = vmul.f32 0.044715, %v1143_v21  ;;  %v1155_v56 = vmul.f32 0.7978846, %v1153_v35  ;;  %v1146_v2 = vmul.f32 0.5, %v1143_v21  ;;  %v1674_v22 = vand.u32 4294901760, %v3429_v39 }
 0x1b3   :  { %1608 = vmatpush.msra.mxu0 %v3443_v40 }
 0x1b4   :  { %v1150_v30 = vmul.f32 %v1148_v49, %v1143_v21  ;;  %2172 = vtanh.f32 %v1155_v56  ;;  %v1675_v35 = vsub.f32 %v3429_v39, %v1674_v22  ;;  %v1680_v49 = vand.u32 4294901760, %v3441_v24 }
 0x1b5   :  { %v3459_v56 = vsub.f32 %v1581_v38, %v3443_v40  ;;  %v3548_v38 = vsub.f32 %v1575_v50, %v3535_v62 }
 0x1b6   :  { %v1152_v33 = vmul.f32 %v1150_v30, %v1143_v21 }
 0x1b8   :  { %v1154_v52 = vadd.f32 %v1152_v33, %v1143_v21  ;;  %v1580_v21 = vld [vmem:[%s3686_s10 + $0x38] sm:$0xff]  ;;  %v1670_v33 = vand.u32 4294901760, %v1669_v55  ;;  %v1573_v55 = vld [vmem:[%s3686_s10] sm:$0xff] }
 0x1b9   :  { %v3461_v30 = vand.u32 4294901760, %v1580_v21 }
 0x1ba   :  { %v2173_v13 = vpop.eup %2172  ;;  %v1156_v48 = vmul.f32 0.7978846, %v1154_v52  ;;  %v1579_v52 = vld [vmem:[%s3686_s10 + $0x30] sm:$0xff]  ;;  %1671 = vmatpush.msra.mxu1 %v1670_v33  ;;  %v1722_v33 = vand.u32 4294901760, %v3548_v38 }
 0x1bb   :  { %v1159_v46 = vadd.f32 1.0, %v2173_v13  ;;  %v1676_v13 = vand.u32 4294901760, %v1675_v35  ;;  %1610 = vmatpush.msra.mxu0 %v3461_v30 }
 0x1bc   :  { %2174 = vtanh.f32 %v1156_v48  ;;  %v1681_v48 = vsub.f32 %v3441_v24, %v1680_v49 }
 0x1bd   :  { %v1161_v36 = vmul.f32 %v1159_v46, %v1145_v28  ;;  %v1686_v28 = vand.u32 4294901760, %v3459_v56  ;;  %v3474_v46 = vsub.f32 %v1580_v21, %v3461_v30  ;;  %1677 = vmatpush.msra.mxu1 %v1676_v13  ;;  %v3567_v13 = vsub.f32 %v1574_v53, %v3552_v45 }
 0x1bf   :  { %v1215_v54 = vand.u32 4294901760, %v1161_v36 }
 0x1c1   :  { %1329 = vmatmul.f32.vlgmr.msrb.gmra.mxu3 %v1215_v54  ;;  %v1216_v14 = vsub.f32 %v1161_v36, %v1215_v54  ;;  %v3477_v36 = vand.u32 4294901760, %v1579_v52 }
 0x1c2   :  { %v2175_v57 = vpop.eup %2174  ;;  %1807 = vmatpush.msrb.mxu3 %v3353_v9 }
 0x1c3   :  { %1387 = vmatmul.f32.vlgmr.msrb.gmra.mxu0 %v1216_v14  ;;  %v1217_v26 = vand.u32 4294901760, %v1216_v14  ;;  %v1160_v27 = vadd.f32 1.0, %v2175_v57  ;;  %v1687_v57 = vsub.f32 %v3459_v56, %v1686_v28 }
 0x1c4   :  { %1809 = vmatpush.msrb.mxu3 %v3361_v16  ;;  %1612 = vmatpush.msra.mxu0 %v3477_v36 }
 0x1c5   :  { %1431 = vmatmul.f32.vlgmr.msrb.gmra.mxu1 %v1217_v26  ;;  %v1218_v8 = vsub.f32 %v1216_v14, %v1217_v26  ;;  %v1162_v17 = vmul.f32 %v1160_v27, %v1146_v2  ;;  %v1682_v14 = vand.u32 4294901760, %v1681_v48  ;;  %v1692_v26 = vand.u32 4294901760, %v3474_v46 }
 0x1c6   :  { %1811 = vmatpush.msrb.mxu3 %v3372_v3  ;;  %v3492_v27 = vsub.f32 %v1579_v52, %v3477_v36  ;;  %v3562_v52 = vand.u32 4294901760, %v1573_v55 }
 0x1c7   :  { %v1219_v5 = vand.u32 4294901760, %v1218_v8  ;;  %v1223_v51 = vand.u32 4294901760, %v1162_v17  ;;  %v1577_v8 = vld [vmem:[%s3686_s10 + $0x20] sm:$0xff]  ;;  %1683 = vmatpush.msra.mxu1 %v1682_v14 }
 0x1c8   :  { %1813 = vmatpush.msrb.mxu3 %v3387_v60  ;;  %v3574_v14 = vsub.f32 %v1573_v55, %v3562_v52 }
 0x1c9   :  { %1220 = vmatmul.f32.vlgmr.msrb.gmra.mxu2 %v1219_v5  ;;  %1333 = vmatmul.f32.gmra.mxu3 %v1223_v51  ;;  %v1224_v6 = vsub.f32 %v1162_v17, %v1223_v51  ;;  %v1688_v17 = vand.u32 4294901760, %v1687_v57  ;;  %v1693_v5 = vsub.f32 %v3474_v46, %v1692_v26  ;;  %v1728_v57 = vand.u32 4294901760, %v3567_v13 }
 0x1ca   :  { %1749 = vmatpush.msrb.mxu2 %v3359_v20  ;;  %1815 = vmatpush.msrb.mxu3 %v3404_v11 }
 0x1cb   :  { %1392 = vmatmul.f32.gmra.mxu0 %v1224_v6  ;;  %v1225_v42 = vand.u32 4294901760, %v1224_v6  ;;  %1689 = vmatpush.msra.mxu1 %v1688_v17  ;;  %v1734_v17 = vand.u32 4294901760, %v3574_v14 }
 0x1cc   :  { %1752 = vmatpush.msrb.mxu2 %v3370_v15  ;;  %1817 = vmatpush.msrb.mxu3 %v3414_v37 }
 0x1cd   :  { %1437 = vmatmul.f32.gmra.mxu1 %v1225_v42  ;;  %v1226_v41 = vsub.f32 %v1224_v6, %v1225_v42  ;;  %v3504_v6 = vand.u32 4294901760, %v1577_v8  ;;  %v1698_v42 = vand.u32 4294901760, %v3492_v27 }
 0x1ce   :  { %1755 = vmatpush.msrb.mxu2 %v3385_v23  ;;  %1819 = vmatpush.msrb.mxu3 %v3431_v34 }
 0x1cf   :  { %v1227_v58 = vand.u32 4294901760, %v1226_v41  ;;  %v1576_v41 = vld [vmem:[%s3686_s10 + $0x18] sm:$0xff]  ;;  %v3515_v18 = vsub.f32 %v1577_v8, %v3504_v6  ;;  %v1699_v44 = vsub.f32 %v3492_v27, %v1698_v42 }
 0x1d0   :  { %1758 = vmatpush.msrb.mxu2 %v3400_v43  ;;  %1821 = vmatpush.msrb.mxu3 %v3443_v40  ;;  %v3517_v32 = vand.u32 4294901760, %v1576_v41 }
 0x1d1   :  { %1228 = vmatmul.f32.gmra.mxu2 %v1227_v58  ;;  %1547 = vmatmul.f32.vlgmr.msra.gmra.mxu3 %v1215_v54  ;;  %v1694_v58 = vand.u32 4294901760, %v1693_v5  ;;  %v1710_v25 = vand.u32 4294901760, %v3515_v18  ;;  %v1700_v4 = vand.u32 4294901760, %v1699_v44  ;;  %v1729_v5 = vsub.f32 %v3567_v13, %v1728_v57 }
 0x1d2   :  { %1761 = vmatpush.msrb.mxu2 %v3418_v19  ;;  %1823 = vmatpush.msrb.mxu3 %v3461_v30  ;;  %v3533_v31 = vsub.f32 %v1576_v41, %v3517_v32  ;;  %v1735_v41 = vsub.f32 %v3574_v14, %v1734_v17 }
 0x1d3   :  { %1695 = vmatpush.msra.mxu1 %v1694_v58  ;;  %v1711_v63 = vsub.f32 %v3515_v18, %v1710_v25  ;;  %v1730_v58 = vand.u32 4294901760, %v1729_v5 }
 0x1d4   :  { %1764 = vmatpush.msrb.mxu2 %v3429_v39  ;;  %1825 = vmatpush.msrb.mxu3 %v3477_v36  ;;  %v1716_v12 = vand.u32 4294901760, %v3533_v31  ;;  %v1736_v44 = vand.u32 4294901760, %v1735_v41 }
 0x1d5   :  { %1701 = vmatpush.msra.mxu1 %v1700_v4  ;;  %v1712_v21 = vand.u32 4294901760, %v1711_v63 }
 0x1d6   :  { %1767 = vmatpush.msrb.mxu2 %v3441_v24  ;;  %v1717_v35 = vsub.f32 %v3533_v31, %v1716_v12 }
 0x1d8   :  { %1770 = vmatpush.msrb.mxu2 %v3459_v56  ;;  %v1718_v48 = vand.u32 4294901760, %v1717_v35 }
 0x1d9   :  { %1506 = vmatmul.f32.vlgmr.msra.gmra.mxu2 %v1215_v54  ;;  %1551 = vmatmul.f32.gmra.mxu3 %v1223_v51  ;;  %v1578_v54 = vld [vmem:[%s3686_s10 + $0x28] sm:$0xff] }
 0x1da   :  { %v3487_v2 = vand.u32 4294901760, %v1578_v54  ;;  %1773 = vmatpush.msrb.mxu2 %v3474_v46 }
 0x1dc   :  { %1614 = vmatpush.msra.mxu0 %v3487_v2  ;;  %1776 = vmatpush.msrb.mxu2 %v3492_v27 }
 0x1dd   :  { %1827 = vmatpush.msrb.mxu3 %v3487_v2 }
 0x1de   :  { %1616 = vmatpush.msra.mxu0 %v3504_v6 }
 0x1df   :  { %1829 = vmatpush.msrb.mxu3 %v3504_v6 }
 0x1e0   :  { %1618 = vmatpush.msra.mxu0 %v3517_v32 }
 0x1e1   :  { %1510 = vmatmul.f32.gmra.mxu2 %v1223_v51  ;;  %v3502_v51 = vsub.f32 %v1578_v54, %v3487_v2  ;;  %1831 = vmatpush.msrb.mxu3 %v3517_v32  ;;  %v1723_v54 = vsub.f32 %v3548_v38, %v1722_v33 }
 0x1e2   :  { %1620 = vmatpush.msra.mxu0 %v3535_v62 }
 0x1e3   :  { %v1704_v7 = vand.u32 4294901760, %v3502_v51  ;;  %1779 = vmatpush.msrb.mxu2 %v3502_v51  ;;  %1833 = vmatpush.msrb.mxu3 %v3535_v62  ;;  %v1724_v8 = vand.u32 4294901760, %v1723_v54  ;;  %v2167_v54 = vld [vmem:[%s3687_s11] ss:$0 sm:$0xff]  ;;  %s2373_s11 = smov [#allocation11]  }
 0x1e4   :  { %1622 = vmatpush.msra.mxu0 %v3552_v45  ;;  %s2099_s0 = sshll.u32 %s2373_s11, 4  ;;  %s2100_s0 = int_to_ptr.vmem [resolvable:$true] %s2099_s0 }
 0x1e5   :  { %v1705_v1 = vsub.f32 %v3502_v51, %v1704_v7  ;;  %1782 = vmatpush.msrb.mxu2 %v3515_v18  ;;  %1835 = vmatpush.msrb.mxu3 %v3552_v45 }
 0x1e6   :  { %1624 = vmatpush.msra.mxu0 %v3562_v52 }
 0x1e7   :  { %v1706_v29 = vand.u32 4294901760, %v1705_v1  ;;  %1785 = vmatpush.msrb.mxu2 %v3533_v31  ;;  %1837 = vmatpush.msrb.mxu3 %v3562_v52 }
 0x1e8   :  { %1854 = vmatpush.msrb.mxu0 %v1644_v10  ;;  %v2166_v10 = vld [vmem:[%s3685_s9] ss:$0 sm:$0xff] }
 0x1e9   :  { %1707 = vmatpush.msra.mxu1 %v1706_v29  ;;  %1788 = vmatpush.msrb.mxu2 %v3548_v38 }
 0x1ea   :  { %1858 = vmatpush.msrb.mxu0 %v1650_v47 }
 0x1eb   :  { %1713 = vmatpush.msra.mxu1 %v1712_v21  ;;  %1791 = vmatpush.msrb.mxu2 %v3567_v13 }
 0x1ec   :  { %1862 = vmatpush.msrb.mxu0 %v1656_v59 }
 0x1ed   :  { %1719 = vmatpush.msra.mxu1 %v1718_v48  ;;  %1794 = vmatpush.msrb.mxu2 %v3574_v14  ;;  %v2014_v48 = vld [vmem:[%s3678_s2] sm:$0xff]  ;;  %v2370_v14 = vmov 0  }
 0x1ee   :  { %1866 = vmatpush.msrb.mxu0 %v1662_v61  ;;  %2162 = vset.pattern.permute.xlu1 %v2370_v14 }
 0x1ef   :  { %1725 = vmatpush.msra.mxu1 %v1724_v8  ;;  %2163 = vset.pattern.permute.xlu0 %v2370_v14 }
 0x1f0   :  { %1870 = vmatpush.msrb.mxu0 %v1668_v0  ;;  %2021 = vperm.xlu1 %2162, %v2014_v48  }
 0x1f1   :  { %1731 = vmatpush.msra.mxu1 %v1730_v58 }
 0x1f2   :  { %1874 = vmatpush.msrb.mxu0 %v1674_v22 }
 0x1f3   :  { %1737 = vmatpush.msra.mxu1 %v1736_v44 }
 0x1f4   :  { %1878 = vmatpush.msrb.mxu0 %v1680_v49 }
 0x1f5   :  { %1925 = vmatpush.msrb.mxu1 %v3353_v9 }
 0x1f6   :  { %1882 = vmatpush.msrb.mxu0 %v1686_v28 }
 0x1f7   :  { %1927 = vmatpush.msrb.mxu1 %v3361_v16 }
 0x1f8   :  { %1886 = vmatpush.msrb.mxu0 %v1692_v26 }
 0x1f9   :  { %1929 = vmatpush.msrb.mxu1 %v3372_v3 }
 0x1fa   :  { %1890 = vmatpush.msrb.mxu0 %v1698_v42 }
 0x1fb   :  { %1931 = vmatpush.msrb.mxu1 %v3387_v60 }
 0x1fc   :  { %1894 = vmatpush.msrb.mxu0 %v1704_v7 }
 0x1fd   :  { %1933 = vmatpush.msrb.mxu1 %v3404_v11 }
 0x1fe   :  { %1898 = vmatpush.msrb.mxu0 %v1710_v25 }
 0x1ff   :  { %1935 = vmatpush.msrb.mxu1 %v3414_v37 }
 0x200   :  { %1902 = vmatpush.msrb.mxu0 %v1716_v12 }
 0x201   :  { %1937 = vmatpush.msrb.mxu1 %v3431_v34 }
 0x202   :  { %1906 = vmatpush.msrb.mxu0 %v1722_v33 }
 0x203   :  { %1939 = vmatpush.msrb.mxu1 %v3443_v40 }
 0x204   :  { %1910 = vmatpush.msrb.mxu0 %v1728_v57 }
 0x205   :  { %1941 = vmatpush.msrb.mxu1 %v3461_v30 }
 0x206   :  { %1914 = vmatpush.msrb.mxu0 %v1734_v17  ;;  %v2015_v17 = vld [vmem:[%s3678_s2 + $0x8] sm:$0xff]  ;;  %s2372_s2 = smov 32  }
 0x207   :  { %1943 = vmatpush.msrb.mxu1 %v3477_v36  ;;  %2026 = vperm.xlu1 %2162, %v2015_v17  }
 0x209   :  { %1945 = vmatpush.msrb.mxu1 %v3487_v2 }
 0x20b   :  { %1947 = vmatpush.msrb.mxu1 %v3504_v6 }
 0x20d   :  { %1949 = vmatpush.msrb.mxu1 %v3517_v32 }
 0x20f   :  { %1951 = vmatpush.msrb.mxu1 %v3535_v62 }
 0x211   :  { %1953 = vmatpush.msrb.mxu1 %v3552_v45 }
 0x213   :  { %1955 = vmatpush.msrb.mxu1 %v3562_v52 }
 0x240   :  { %v1388_v16 = vpop.f32.mrf.mxu0 }
 0x242   :  { %v1432_v60 = vpop.f32.mrf.mxu1 }
 0x244   :  { %v1330_v20 = vpop.f32.mrf.mxu3 }
 0x248   :  { %v1393_v34 = vpop.f32.mrf.mxu0 }
 0x24a   :  { %v1438_v40 = vpop.f32.mrf.mxu1 }
 0x24c   :  { %v1221_v15 = vpop.f32.mrf.mxu2  ;;  %v1334_v9 = vpop.f32.mrf.mxu3 }
 0x24d   :  { %v1222_v47 = vadd.f32 %v2166_v10, %v1221_v15 }
 0x24f   :  { %v1331_v23 = vadd.f32 %v1330_v20, %v1222_v47 }
 0x251   :  { %v1389_v43 = vadd.f32 %v1388_v16, %v1331_v23 }
 0x253   :  { %v1433_v61 = vadd.f32 %v1432_v60, %v1389_v43 }
 0x254   :  { %v1229_v59 = vpop.f32.mrf.mxu2  ;;  %v1548_v37 = vpop.f32.mrf.mxu3 }
 0x255   :  { %v1230_v3 = vadd.f32 %v2166_v10, %v1229_v59 }
 0x257   :  { %v1335_v11 = vadd.f32 %v1334_v9, %v1230_v3 }
 0x259   :  { %v1394_v22 = vadd.f32 %v1393_v34, %v1335_v11 }
 0x25b   :  { %v1439_v49 = vadd.f32 %v1438_v40, %v1394_v22 }
 0x25c   :  { %v1507_v19 = vpop.f32.mrf.mxu2  ;;  %v1552_v36 = vpop.f32.mrf.mxu3 }
 0x25d   :  { %v1508_v39 = vadd.f32 %v1507_v19, %v1433_v61 }
 0x25f   :  { %v1549_v0 = vadd.f32 %v1548_v37, %v1508_v39 }
 0x261   :  { %2080 = vst [vmem:[#allocation13] sm:$0xff] %v1549_v0  ;;  %v1557_v24 = vmul.f32 0.044715, %v1549_v0  ;;  %v1555_v50 = vmul.f32 0.5, %v1549_v0 }
 0x263   :  { %v1559_v56 = vmul.f32 %v1557_v24, %v1549_v0  ;;  %v1972_v24 = vlaneseq }
 0x264   :  { %v1511_v30 = vpop.f32.mrf.mxu2 }
 0x265   :  { %v1512_v28 = vadd.f32 %v1511_v30, %v1439_v49  ;;  %v1561_v46 = vmul.f32 %v1559_v56, %v1549_v0  ;;  %v1973_v40 = vand.u32 127, %v1972_v24 }
 0x267   :  { %v1553_v26 = vadd.f32 %v1552_v36, %v1512_v28  ;;  %v1563_v27 = vadd.f32 %v1561_v46, %v1549_v0 }
 0x269   :  { %2081 = vst [vmem:[#allocation13 + $0x8] sm:$0xff] %v1553_v26  ;;  %v1565_v2 = vmul.f32 0.7978846, %v1563_v27  ;;  %v1558_v51 = vmul.f32 0.044715, %v1553_v26  ;;  %v1556_v29 = vmul.f32 0.5, %v1553_v26 }
 0x26b   :  { %2176 = vtanh.f32 %v1565_v2  ;;  %v1560_v6 = vmul.f32 %v1558_v51, %v1553_v26 }
 0x26d   :  { %v1562_v42 = vmul.f32 %v1560_v6, %v1553_v26  ;;  %v2371_v6 = vmov 360.0  }
 0x26f   :  { %v1564_v7 = vadd.f32 %v1562_v42, %v1553_v26 }
 0x271   :  { %v2177_v18 = vpop.eup %2176  ;;  %v1566_v32 = vmul.f32 0.7978846, %v1564_v7  ;;  %v2016_v7 = vcvt.s32.f32 %v1973_v40 }
 0x272   :  { %v1569_v1 = vadd.f32 1.0, %v2177_v18 }
 0x273   :  { %2178 = vtanh.f32 %v1566_v32  ;;  %v2017_v32 = vmul.f32 22.5, %v2016_v7 }
 0x274   :  { %v1571_v25 = vmul.f32 %v1569_v1, %v1555_v50  ;;  %2180 = vrcp.f32 %v2371_v6 }
 0x275   :  { %v2018_v1 = vadd.f32 -180.0, %v2017_v32 }
 0x276   :  { %v1625_v31 = vand.u32 4294901760, %v1571_v25 }
 0x278   :  { %1739 = vmatmul.f32.vlgmr.msra.gmra.mxu1 %v1625_v31  ;;  %v1626_v62 = vsub.f32 %v1571_v25, %v1625_v31 }
 0x279   :  { %v2179_v4 = vpop.eup %2178 }
 0x27a   :  { %1797 = vmatmul.f32.vlgmr.msrb.gmra.mxu2 %v1626_v62  ;;  %v1627_v53 = vand.u32 4294901760, %v1626_v62  ;;  %v1570_v63 = vadd.f32 1.0, %v2179_v4  ;;  %v2181_v42 = vpop.eup %2180 }
 0x27b   :  { %v2034_v18 = vmul.f32 360.0, %v2181_v42  ;;  %vm2038_vm4 = vweird.f32 %v2181_v42 }
 0x27c   :  { %1841 = vmatmul.f32.vlgmr.msrb.gmra.mxu3 %v1627_v53  ;;  %v1628_v12 = vsub.f32 %v1626_v62, %v1627_v53  ;;  %v1572_v38 = vmul.f32 %v1570_v63, %v1556_v29 }
 0x27d   :  { %v2035_v50 = vsub.f32 1.0, %v2034_v18 }
 0x27e   :  { %v1629_v45 = vand.u32 4294901760, %v1628_v12  ;;  %v1633_v55 = vand.u32 4294901760, %v1572_v38 }
 0x27f   :  { %v2036_v25 = vmul.f32 %v2181_v42, %v2035_v50 }
 0x280   :  { %1630 = vmatmul.f32.vlgmr.msra.gmra.mxu0 %v1629_v45  ;;  %1743 = vmatmul.f32.gmra.mxu1 %v1633_v55  ;;  %v1634_v21 = vsub.f32 %v1572_v38, %v1633_v55 }
 0x281   :  { %v2037_v4 = vadd.f32 %v2181_v42, %v2036_v25 }
 0x282   :  { %1802 = vmatmul.f32.gmra.mxu2 %v1634_v21  ;;  %v1635_v35 = vand.u32 4294901760, %v1634_v21 }
 0x283   :  { %v2039_v29 = vsel %vm2038_vm4, %v2181_v42, %v2037_v4 }
 0x284   :  { %1847 = vmatmul.f32.gmra.mxu3 %v1635_v35  ;;  %v1636_v33 = vsub.f32 %v1634_v21, %v1635_v35 }
 0x286   :  { %v1637_v52 = vand.u32 4294901760, %v1636_v33 }
 0x288   :  { %1638 = vmatmul.f32.gmra.mxu0 %v1637_v52  ;;  %1957 = vmatmul.f32.vlgmr.msrb.gmra.mxu1 %v1625_v31 }
 0x290   :  { %1916 = vmatmul.f32.vlgmr.msrb.gmra.mxu0 %v1625_v31  ;;  %1961 = vmatmul.f32.gmra.mxu1 %v1633_v55  ;;  %v2022_v31 = vpop.permute.xlu1 %2021 }
 0x291   :  { %v2029_v62 = vsub.f32 %v2022_v31, %v2018_v1 }
 0x293   :  { %v2031_v53 = vadd.f32 180.0, %v2029_v62 }
 0x295   :  { %v2040_v63 = vmul.f32 %v2039_v29, %v2031_v53 }
 0x297   :  { %v2042_v12 = vfloor.f32 %v2040_v63 }
 0x298   :  { %1920 = vmatmul.f32.gmra.mxu0 %v1633_v55  ;;  %v2027_v52 = vpop.permute.xlu1 %2026 }
 0x299   :  { %v2044_v38 = vmul.f32 360.0, %v2042_v12  ;;  %v2030_v48 = vsub.f32 %v2027_v52, %v2018_v1 }
 0x29b   :  { %v2046_v45 = vsub.f32 %v2029_v62, %v2044_v38  ;;  %v2032_v14 = vadd.f32 180.0, %v2030_v48 }
 0x29d   :  { %v2048_v55 = vmul.f32 %v2046_v45, %v2046_v45 }
 0x29f   :  { %v2050_v21 = vsub.f32 0.0, %v2048_v55 }
 0x2a1   :  { %v2052_v35 = vmul.f32 0.0019753086, %v2050_v21 }
 0x2a3   :  { %v2054_v33 = vmul.f32 1.442695, %v2052_v35 }
 0x2a5   :  { %2182 = vpow2.f32 %v2054_v33 }
 0x2f5   :  { %v1740_v13 = vpop.f32.mrf.mxu1 }
 0x2fd   :  { %v1631_v57 = vpop.f32.mrf.mxu0  ;;  %v1744_v5 = vpop.f32.mrf.mxu1 }
 0x2fe   :  { %v1632_v8 = vadd.f32 %v2167_v54, %v1631_v57  ;;  %v1798_v58 = vpop.f32.mrf.mxu2  ;;  %v2041_v57 = vmul.f32 %v2039_v29, %v2032_v14 }
 0x2ff   :  { %v1842_v15 = vpop.f32.mrf.mxu3 }
 0x300   :  { %v1741_v41 = vadd.f32 %v1740_v13, %v1632_v8  ;;  %v2183_v13 = vpop.eup %2182  ;;  %v2043_v8 = vfloor.f32 %v2041_v57 }
 0x301   :  { %vm2058_vm5 = vcmp.ne.f32.partialorder %v2183_v13, %v2183_v13 }
 0x302   :  { %v1799_v20 = vadd.f32 %v1798_v58, %v1741_v41  ;;  %v2045_v17 = vmul.f32 360.0, %v2043_v8 }
 0x304   :  { %v1843_v47 = vadd.f32 %v1842_v15, %v1799_v20 }
 0x305   :  { %v1639_v44 = vpop.f32.mrf.mxu0  ;;  %v1958_v23 = vpop.f32.mrf.mxu1 }
 0x306   :  { %v1640_v10 = vadd.f32 %v2167_v54, %v1639_v44  ;;  %v1803_v3 = vpop.f32.mrf.mxu2  ;;  %v2060_v54 = vsel %vm2058_vm5, 0.0, %v2183_v13 }
 0x307   :  { %v1848_v61 = vpop.f32.mrf.mxu3 }
 0x308   :  { %v1745_v9 = vadd.f32 %v1744_v5, %v1640_v10  ;;  %v2047_v5 = vsub.f32 %v2030_v48, %v2045_v17 }
 0x30a   :  { %v1804_v43 = vadd.f32 %v1803_v3, %v1745_v9  ;;  %v2049_v41 = vmul.f32 %v2047_v5, %v2047_v5 }
 0x30c   :  { %v1849_v37 = vadd.f32 %v1848_v61, %v1804_v43  ;;  %v2051_v44 = vsub.f32 0.0, %v2049_v41 }
 0x30d   :  { %v1917_v16 = vpop.f32.mrf.mxu0  ;;  %v1962_v34 = vpop.f32.mrf.mxu1 }
 0x30e   :  { %v1918_v59 = vadd.f32 %v1917_v16, %v1843_v47  ;;  %v2053_v15 = vmul.f32 0.0019753086, %v2051_v44 }
 0x310   :  { %v1959_v60 = vadd.f32 %v1958_v23, %v1918_v59  ;;  %v2056_v23 = vmul.f32 1.442695, %v2053_v15 }
 0x312   :  { %v1966_v11 = vsel %vm1965_vm1, %v1959_v60, -inf  ;;  %2075 = vst.msk [vmem:[#allocation11] sm:$0xff] %vm1965_vm1, %v1959_v60  ;;  %2184 = vpow2.f32 %v2056_v23 }
 0x313   :  { %1967 = vmax.xlane.f32.xlu0 %v1966_v11 }
 0x315   :  { %v1921_v19 = vpop.f32.mrf.mxu0 }
 0x316   :  { %v1922_v39 = vadd.f32 %v1921_v19, %v1849_v37 }
 0x318   :  { %v1963_v0 = vadd.f32 %v1962_v34, %v1922_v39  ;;  %v2185_v43 = vpop.eup %2184 }
 0x319   :  { %vm2059_vm8 = vcmp.ne.f32.partialorder %v2185_v43, %v2185_v43 }
 0x31a   :  { %2076 = vst.msk [vmem:[#allocation11 + $0x8] sm:$0xff] %vm1965_vm1, %v1963_v0  ;;  %v1969_v22 = vsel %vm1965_vm1, %v1963_v0, -inf }
 0x31b   :  { %1970 = vmax.xlane.f32.xlu0 %v1969_v22  ;;  %2107 = dma.vmem_to_hbm [thread:$0]  %s2100_s0, 256, %s2102_s23, [#allocation12], %s2365_s26, %s2365_s26, %s2366_s27  }
 0x31c   :  { %2122 = dma.vmem_to_hbm [thread:$0]  %s2115_s24, 256, %s2117_s29, [#allocation12], %s2365_s26, %s2365_s26, %s2366_s27  }
 0x386   :  { %v1968_v49 = vpop.xlane.xlu0 %1967 }
 0x387   :  { %vm1974_vm2 = vcmp.eq.f32.partialorder %v1959_v60, %v1968_v49  ;;  %v2061_v60 = vsel %vm2059_vm8, 0.0, %v2185_v43 }
 0x388   :  { %v1976_v56 = vsel %vm1974_vm2, %v1973_v40, 16 }
 0x389   :  { %v1978_v30 = vsel %vm1965_vm1, %v1976_v56, 2147483647 }
 0x38a   :  { %v1980_v28 = vshra.s32 %v1978_v30, 16  ;;  %v1979_v58 = vand.u32 65535, %v1978_v30 }
 0x38c   :  { %v1982_v46 = vcvt.s32.f32 %v1980_v28  ;;  %v1981_v10 = vcvt.s32.f32 %v1979_v58 }
 0x38e   :  { %1983 = vmin.xlane.f32.xlu2 %v1982_v46  ;;  %v1971_v36 = vpop.xlane.xlu0 %1970 }
 0x38f   :  { %vm1975_vm3 = vcmp.eq.f32.partialorder %v1963_v0, %v1971_v36 }
 0x390   :  { %v1977_v26 = vsel %vm1975_vm3, %v1973_v40, 16 }
 0x391   :  { %v1993_v27 = vsel %vm1965_vm1, %v1977_v26, 2147483647 }
 0x392   :  { %v1995_v2 = vshra.s32 %v1993_v27, 16  ;;  %v1994_v9 = vand.u32 65535, %v1993_v27 }
 0x394   :  { %v1997_v51 = vcvt.s32.f32 %v1995_v2  ;;  %v1996_v59 = vcvt.s32.f32 %v1994_v9 }
 0x396   :  { %1998 = vmin.xlane.f32.xlu2 %v1997_v51 }
 0x3ae   :  { %2066 = vrot.lane.b32.xlu2 %v2060_v54, %s2372_s2 }
 0x401   :  { %v1984_v20 = vpop.xlane.xlu2 %1983 }
 0x402   :  { %vm1985_vm6 = vcmp.eq.f32.partialorder %v1982_v46, %v1984_v20  ;;  %v1990_v61 = vcvt.f32.s32 %v1984_v20 }
 0x403   :  { %v1986_v47 = vsel %vm1985_vm6, %v1981_v10, inf }
 0x404   :  { %1987 = vmin.xlane.f32.xlu0 %v1986_v47  ;;  %v1991_v19 = vshll.u32 %v1990_v61, 16 }
 0x409   :  { %v1999_v16 = vpop.xlane.xlu2 %1998 }
 0x40a   :  { %vm2000_vm7 = vcmp.eq.f32.partialorder %v1997_v51, %v1999_v16  ;;  %v2005_v0 = vcvt.f32.s32 %v1999_v16 }
 0x40b   :  { %v2001_v3 = vsel %vm2000_vm7, %v1996_v59, inf }
 0x40c   :  { %2002 = vmin.xlane.f32.xlu1 %v2001_v3  ;;  %v2006_v49 = vshll.u32 %v2005_v0, 16 }
 0x411   :  { %v2067_v11 = vpop.permute.xlu2 %2066 }
 0x412   :  { %2073 = vst.msk [vmem:[#allocation10] sm:$0xff] %vm2072_vm9, %v2067_v11 }
 0x418   :  { %2068 = vrot.lane.b32.xlu0 %v2061_v60, %s2372_s2 }
 0x477   :  { %v1988_v37 = vpop.xlane.xlu0 %1987 }
 0x478   :  { %v1989_v39 = vcvt.f32.s32 %v1988_v37 }
 0x47a   :  { %v1992_v34 = vadd.s32 %v1991_v19, %v1989_v39 }
 0x47c   :  { %v2008_v22 = vcvt.s32.f32 %v1992_v34 }
 0x47e   :  { %v2010_v24 = vmul.f32 22.5, %v2008_v22 }
 0x47f   :  { %v2003_v40 = vpop.xlane.xlu1 %2002 }
 0x480   :  { %v2012_v56 = vadd.f32 -180.0, %v2010_v24  ;;  %v2004_v30 = vcvt.f32.s32 %v2003_v40 }
 0x482   :  { %2078 = vst.msk [vmem:[%s3690_s14] sm:$0xff] %vm2077_vm10, %v2012_v56  ;;  %v2007_v28 = vadd.s32 %v2006_v49, %v2004_v30 }
 0x484   :  { %v2009_v46 = vcvt.s32.f32 %v2007_v28 }
 0x486   :  { %v2011_v36 = vmul.f32 22.5, %v2009_v46 }
 0x488   :  { %v2013_v26 = vadd.f32 -180.0, %v2011_v36 }
 0x48a   :  { %2079 = vst.msk [vmem:[%s3690_s14 + $0x8] sm:$0xff] %vm2077_vm10, %v2013_v26  ;;  %v2069_v27 = vpop.permute.xlu0 %2068 }
 0x48b   :  { %2074 = vst.msk [vmem:[#allocation10 + $0x8] sm:$0xff] %vm2072_vm9, %v2069_v27 }
 0x48c   :  { %2094 = dma.vmem_to_hbm [thread:$0]  %s2087_s16, 256, %s2089_s17, [#allocation4], %s2365_s26, %s2365_s26, %s2366_s27  }
 0x48d   :  { %2360 = dma.done.wait [#allocation4], 256  }
 0x48e   :  { %2361 = vsyncadd [#allocation4], 4294967040 }
 0x48f   :  { %2362 = dma.done.wait [#allocation12], 512  }
 0x490   :  { %2363 = vsyncadd [#allocation12], 4294966784 }
 0x491   :  { %2137 = vsyncpa [#allocation3], 1 }
 0x492   :  { %2138 = vsyncpa [#allocation6], 1 }
 0x493   :  { %2139 = vsyncpa [#allocation9], 1 }
 0x494   :  { %2140 = vsyncpa [#allocation4], 1 }
 0x495   :  { %2141 = vsyncpa [#allocation12], 1 }

</bundles_post_ra>
